<compile_context>
chip_gen: v5e
topology: v5e:2x2
jax: 0.10.0
libtpu: 0.0.40
codegen_flags: <defaults>
</compile_context>

<pallas_src>
import functools

import jax
import jax.numpy as jnp
from jax.experimental import pallas as pl
from jax.experimental.pallas import tpu as pltpu


def _round_up(x, m):
    return ((x + m - 1) // m) * m


def _block_diag(mats):
    """Pack per-group (r, c) weight matrices into a (g*r, g*c) block-diagonal matrix."""
    g = len(mats)
    r, c = mats[0].shape
    out = jnp.zeros((g * r, g * c), dtype=mats[0].dtype)
    for i, m in enumerate(mats):
        out = out.at[i * r:(i + 1) * r, i * c:(i + 1) * c].set(m)
    return out


def ffn_kernel(x_ref, w1_ref, b1_ref, w2_ref, b2_ref, o_ref, *, approximate_gelu):
    # x_ref : (1, C, TL)    current batch row, full channel slab, TL lanes (tail masked)
    # w1_ref: (GH, C)       block-diagonal conv1 weight, VMEM-resident (compute dtype)
    # b1_ref: (GH, 1)       f32
    # w2_ref: (C, GH)       block-diagonal conv2 weight, VMEM-resident (compute dtype)
    # b2_ref: (C, 1)        f32
    # o_ref : (1, C, TL)
    x = x_ref[0]                                                       # (C, TL)

    # (GH, C) @ (C, TL) -> (GH, TL), f32 accumulation on the MXU.
    h = jnp.dot(w1_ref[...], x, preferred_element_type=jnp.float32)
    h = h + b1_ref[...]                                                # broadcast over lanes
    h = jax.nn.gelu(h, approximate=approximate_gelu)                   # f32 activation

    # (C, GH) @ (GH, TL) -> (C, TL)
    y = jnp.dot(w2_ref[...], h.astype(x.dtype), preferred_element_type=jnp.float32)
    y = y + b2_ref[...]
    o_ref[0] = y.astype(o_ref.dtype)


def feed_forward_pallas(x_ncl, w1, b1, w2, b2, *, tl=None,
                        compute_dtype=jnp.bfloat16, out_dtype=None,
                        approximate_gelu=True):
    """Grouped 1x1-conv FFN:  Conv1d(groups) -> GELU -> Conv1d(groups).

    x_ncl: (B, groups*dim, L).   w1: (G, hdim, dim), b1: (G, hdim, 1),
    w2: (G, dim, hdim), b2: (G, dim, 1).   Returns (B, groups*dim, L) in out_dtype.

    Set approximate_gelu=False for bit-level parity with torch nn.GELU() (exact erf);
    the tanh approximation error (<~3e-3) is below bf16 rounding noise at default dtypes.
    """
    groups, hdim, dim = w1.shape
    B, C, L = x_ncl.shape
    assert C == groups * dim
    GH = groups * hdim
    out_dtype = out_dtype or compute_dtype

    # bf16 (compute_dtype) I/O at the kernel boundary: avoid paying f32 HBM traffic.
    if x_ncl.dtype != compute_dtype:
        x_ncl = x_ncl.astype(compute_dtype)

    # Block-diagonal packing of the grouped weights (done once at trace time; the
    # zero-padding FLOPs are free while the kernel is memory-bound).
    w1bd = _block_diag([w1[g].astype(compute_dtype) for g in range(groups)])   # (GH, C)
    w2bd = _block_diag([w2[g].astype(compute_dtype) for g in range(groups)])   # (C, GH)
    b1f = b1.reshape(GH, 1).astype(jnp.float32)
    b2f = b2.reshape(C, 1).astype(jnp.float32)

    if tl is None:
        # Big lane tiles amortize the ~0.35us per-grid-step overhead; cap so the f32
        # hidden intermediate (GH x tl) stays within ~12 MiB -> whole footprint fits
        # comfortably under v7x's 64 MiB physical VMEM (and v5e/v6e's 128 MiB).
        hidden_budget = 12 * 1024 * 1024
        cap = max(128, (hidden_budget // (GH * 4)) // 128 * 128)
        tl = min(8192, cap, _round_up(L, 128))
    n_lt = pl.cdiv(L, tl)

    kernel = functools.partial(ffn_kernel, approximate_gelu=approximate_gelu)

    out = pl.pallas_call(
        kernel,
        out_shape=jax.ShapeDtypeStruct((B, C, L), out_dtype),
        grid_spec=pltpu.PrefetchScalarGridSpec(
            num_scalar_prefetch=0,
            # Row (batch) axis leading so each TC streams contiguous L for a given row
            # when the grid is sharded across cores (v7x megacore).
            grid=(B, n_lt),
            in_specs=[
                pl.BlockSpec((1, C, tl), lambda b, l: (b, 0, l)),
                # Weights/biases: full arrays, same block every step -> DMA'd once,
                # VMEM-resident for the whole grid.
                pl.BlockSpec((GH, C), lambda b, l: (0, 0)),
                pl.BlockSpec((GH, 1), lambda b, l: (0, 0)),
                pl.BlockSpec((C, GH), lambda b, l: (0, 0)),
                pl.BlockSpec((C, 1), lambda b, l: (0, 0)),
            ],
            out_specs=pl.BlockSpec((1, C, tl), lambda b, l: (b, 0, l)),
        ),
        compiler_params=pltpu.CompilerParams(
            dimension_semantics=("parallel", "parallel"),
            # Above v5e's 16 MiB / v6e's 32 MiB default scoped limit, below v7x's
            # 64 MiB physical VMEM.  Footprint at the largest default tile:
            # double-buffered bf16 x/out slabs + resident weights + f32 hidden ~ <32 MiB.
            vmem_limit_bytes=48 * 1024 * 1024,
        ),
    )(x_ncl, w1bd, b1f, w2bd, b2f)

    return out


def reference(x_ncl, w1, b1, w2, b2):
    """f32 reference matching torch: Conv1d(groups) -> exact GELU -> Conv1d(groups)."""
    groups, hdim, dim = w1.shape
    B, C, L = x_ncl.shape
    xg = x_ncl.astype(jnp.float32).reshape(B, groups, dim, L)
    h = jnp.einsum("bgdl,ghd->bghl", xg, w1) + b1[None]
    h = jax.nn.gelu(h, approximate=False)
    y = jnp.einsum("bghl,gdh->bgdl", h, w2) + b2[None]
    return y.reshape(B, C, L)


if __name__ == "__main__":
    # Module hyperparameters (small, deterministic).
    dim, mult, groups = 32, 4, 2
    B, L = 2, 256
    C = dim * groups              # input_dim = 64
    H = dim * mult                # hidden per group = 128

    key = jax.random.PRNGKey(0)
    kx, k1, kb1, k2, kb2 = jax.random.split(key, 5)

    # Activations already in bf16 (kernel I/O dtype) -> no extra HBM cast pass.
    x = jax.random.normal(kx, (B, C, L), dtype=jnp.float32).astype(jnp.bfloat16)

    # Grouped 1x1 Conv1d params, stored per group:
    #   torch conv1.weight (G*H, dim, 1) -> w1: (G, H, dim); bias (G*H,) -> (G, H, 1)
    #   torch conv2.weight (G*dim, H, 1) -> w2: (G, dim, H); bias (G*dim,) -> (G, dim, 1)
    w1 = jax.random.normal(k1, (groups, H, dim), dtype=jnp.float32) * (1.0 / dim**0.5)
    b1 = jax.random.normal(kb1, (groups, H, 1), dtype=jnp.float32) * 0.02
    w2 = jax.random.normal(k2, (groups, dim, H), dtype=jnp.float32) * (1.0 / H**0.5)
    b2 = jax.random.normal(kb2, (groups, dim, 1), dtype=jnp.float32) * 0.02

    y = feed_forward_pallas(x, w1, b1, w2, b2)          # bf16 I/O, bf16 MXU, f32 acc
    y = jax.block_until_ready(y)

    y_ref = reference(x, w1, b1, w2, b2)
    assert y.shape == (B, C, L)
    # bf16 operands/IO on the MXU (+ tanh GELU) vs. the exact-erf f32 reference.
    err = float(jnp.max(jnp.abs(y.astype(jnp.float32) - y_ref)))
    assert jnp.allclose(y.astype(jnp.float32), y_ref, atol=5e-2, rtol=5e-2), err

    print("KERNEL_OK")
</pallas_src>

<mosaic_0001>
module attributes {stable_mosaic.version = 11 : i64} {
  func.func @ffn_kernel(%arg0: i32, %arg1: i32, %arg2: memref<1x64x256xbf16, #tpu.memory_space<vmem>>, %arg3: memref<256x64xbf16, #tpu.memory_space<vmem>>, %arg4: memref<256x1xf32, #tpu.memory_space<vmem>>, %arg5: memref<64x256xbf16, #tpu.memory_space<vmem>>, %arg6: memref<64x1xf32, #tpu.memory_space<vmem>>, %arg7: memref<1x64x256xbf16, #tpu.memory_space<vmem>>) attributes {dimension_semantics = [#tpu.dimension_semantics<parallel>, #tpu.dimension_semantics<parallel>], iteration_bounds = array<i64: 2, 1>, scalar_prefetch = 0 : i64, scratch_operands = 0 : i64, tpu.core_type = #tpu.core_type<tc>, window_params = [{transform_indices = @transform_0, window_bounds = array<i64: 1, 64, 256>}, {pipeline_mode = #tpu.pipeline_mode<synchronous>, transform_indices = @transform_1, window_bounds = array<i64: 256, 64>}, {pipeline_mode = #tpu.pipeline_mode<synchronous>, transform_indices = @transform_2, window_bounds = array<i64: 256, 1>}, {pipeline_mode = #tpu.pipeline_mode<synchronous>, transform_indices = @transform_3, window_bounds = array<i64: 64, 256>}, {pipeline_mode = #tpu.pipeline_mode<synchronous>, transform_indices = @transform_4, window_bounds = array<i64: 64, 1>}, {transform_indices = @transform_5, window_bounds = array<i64: 1, 64, 256>}]} {
    %c0 = arith.constant 0 : index
    %c0_0 = arith.constant 0 : index
    %c0_1 = arith.constant 0 : index
    %0 = vector.load %arg2[%c0, %c0_0, %c0_1] : memref<1x64x256xbf16, #tpu.memory_space<vmem>>, vector<1x64x256xbf16>
    %1 = vector.shape_cast %0 : vector<1x64x256xbf16> to vector<64x256xbf16>
    %c0_2 = arith.constant 0 : index
    %c0_3 = arith.constant 0 : index
    %2 = vector.load %arg3[%c0_2, %c0_3] : memref<256x64xbf16, #tpu.memory_space<vmem>>, vector<256x64xbf16>
    %cst = arith.constant dense<0.000000e+00> : vector<256x256xf32>
    %3 = tpu.matmul %2, %1, %cst {dimension_numbers = #tpu.dot_dimension_numbers<[1], [0], [0], [1], [0, 0, 1, 1], [], []>} : vector<256x64xbf16>, vector<64x256xbf16>, vector<256x256xf32> -> vector<256x256xf32>
    %c0_4 = arith.constant 0 : index
    %c0_5 = arith.constant 0 : index
    %4 = vector.load %arg4[%c0_4, %c0_5] : memref<256x1xf32, #tpu.memory_space<vmem>>, vector<256x1xf32>
    %5 = vector.broadcast %4 : vector<256x1xf32> to vector<256x256xf32>
    %6 = arith.addf %3, %5 : vector<256x256xf32>
    %7 = arith.mulf %6, %6 : vector<256x256xf32>
    %8 = arith.mulf %6, %7 : vector<256x256xf32>
    %cst_6 = arith.constant 4.471500e-02 : f32
    %9 = vector.broadcast %cst_6 : f32 to vector<256x256xf32>
    %10 = arith.mulf %9, %8 : vector<256x256xf32>
    %11 = arith.addf %6, %10 : vector<256x256xf32>
    %cst_7 = arith.constant 0.797884583 : f32
    %12 = vector.broadcast %cst_7 : f32 to vector<256x256xf32>
    %13 = arith.mulf %12, %11 : vector<256x256xf32>
    %14 = math.tanh %13 : vector<256x256xf32>
    %cst_8 = arith.constant 1.000000e+00 : f32
    %15 = vector.broadcast %cst_8 : f32 to vector<256x256xf32>
    %16 = arith.addf %15, %14 : vector<256x256xf32>
    %cst_9 = arith.constant 5.000000e-01 : f32
    %17 = vector.broadcast %cst_9 : f32 to vector<256x256xf32>
    %18 = arith.mulf %17, %16 : vector<256x256xf32>
    %19 = arith.mulf %6, %18 : vector<256x256xf32>
    %c0_10 = arith.constant 0 : index
    %c0_11 = arith.constant 0 : index
    %20 = vector.load %arg5[%c0_10, %c0_11] : memref<64x256xbf16, #tpu.memory_space<vmem>>, vector<64x256xbf16>
    %21 = arith.truncf %19 : vector<256x256xf32> to vector<256x256xbf16>
    %cst_12 = arith.constant dense<0.000000e+00> : vector<64x256xf32>
    %22 = tpu.matmul %20, %21, %cst_12 {dimension_numbers = #tpu.dot_dimension_numbers<[1], [0], [0], [1], [0, 0, 1, 1], [], []>} : vector<64x256xbf16>, vector<256x256xbf16>, vector<64x256xf32> -> vector<64x256xf32>
    %c0_13 = arith.constant 0 : index
    %c0_14 = arith.constant 0 : index
    %23 = vector.load %arg6[%c0_13, %c0_14] : memref<64x1xf32, #tpu.memory_space<vmem>>, vector<64x1xf32>
    %24 = vector.broadcast %23 : vector<64x1xf32> to vector<64x256xf32>
    %25 = arith.addf %22, %24 : vector<64x256xf32>
    %26 = arith.truncf %25 : vector<64x256xf32> to vector<64x256xbf16>
    %c0_15 = arith.constant 0 : index
    %c0_16 = arith.constant 0 : index
    %c0_17 = arith.constant 0 : index
    %27 = vector.load %arg7[%c0_15, %c0_16, %c0_17] : memref<1x64x256xbf16, #tpu.memory_space<vmem>>, vector<1x64x256xbf16>
    %28 = vector.shape_cast %27 : vector<1x64x256xbf16> to vector<64x256xbf16>
    %29 = vector.shape_cast %26 : vector<64x256xbf16> to vector<1x64x256xbf16>
    tpu.vector_store %arg7[%c0_15, %c0_16, %c0_17], %29 {strides = array<i32>} : memref<1x64x256xbf16, #tpu.memory_space<vmem>>, vector<1x64x256xbf16>,
    return
  }
  func.func @transform_0(%arg0: i32, %arg1: i32) -> (i32, i32, i32) {
    %c0_i32 = arith.constant 0 : i32
    %c0_i32_0 = arith.constant 0 : i32
    return %arg0, %c0_i32, %arg1 : i32, i32, i32
  }
  func.func @transform_1(%arg0: i32, %arg1: i32) -> (i32, i32) {
    %c0_i32 = arith.constant 0 : i32
    %c0_i32_0 = arith.constant 0 : i32
    %c0_i32_1 = arith.constant 0 : i32
    return %c0_i32, %c0_i32_0 : i32, i32
  }
  func.func @transform_2(%arg0: i32, %arg1: i32) -> (i32, i32) {
    %c0_i32 = arith.constant 0 : i32
    %c0_i32_0 = arith.constant 0 : i32
    %c0_i32_1 = arith.constant 0 : i32
    return %c0_i32, %c0_i32_0 : i32, i32
  }
  func.func @transform_3(%arg0: i32, %arg1: i32) -> (i32, i32) {
    %c0_i32 = arith.constant 0 : i32
    %c0_i32_0 = arith.constant 0 : i32
    %c0_i32_1 = arith.constant 0 : i32
    return %c0_i32, %c0_i32_0 : i32, i32
  }
  func.func @transform_4(%arg0: i32, %arg1: i32) -> (i32, i32) {
    %c0_i32 = arith.constant 0 : i32
    %c0_i32_0 = arith.constant 0 : i32
    %c0_i32_1 = arith.constant 0 : i32
    return %c0_i32, %c0_i32_0 : i32, i32
  }
  func.func @transform_5(%arg0: i32, %arg1: i32) -> (i32, i32, i32) {
    %c0_i32 = arith.constant 0 : i32
    %c0_i32_0 = arith.constant 0 : i32
    return %arg0, %c0_i32, %arg1 : i32, i32, i32
  }
}

</mosaic_0001>

<bundles_post_ra>
// kernel: tpu_custom_call.1
= control target key start
LH: loop header
LB: loop body
LE: loop exit
PB: predicated region body
PF: predicated region fallthrough
CT: control target
= control target key end

     0   :  { %10 = vsyncpa [#allocation3], 0  ;;  %s3502_s0 = inlined_call_operand.vmem [shape: bf16[2,64,256], index: 0, kind: input, shape index: {}]   ;;  %s3503_s1 = inlined_call_operand.vmem [shape: bf16[256,64], index: 1, kind: input, shape index: {}]   ;;  %s3504_s2 = inlined_call_operand.vmem [shape: f32[256,1], index: 2, kind: input, shape index: {}]   ;;  %s3505_s3 = inlined_call_operand.vmem [shape: bf16[64,256], index: 3, kind: input, shape index: {}]   ;;  %s3506_s4 = inlined_call_operand.vmem [shape: f32[64,1], index: 4, kind: input, shape index: {}]   ;;  %s3507_s5 = inlined_call_operand.hbm [shape: bf16[2,64,256], index: 5, kind: output, shape index: {}]  }
   0x1   :  { %12 = vsyncpa [#allocation3 + $0x1], 0  ;;  %s2284_s18 = smov 0   ;;  %s2286_s19 = smov 0  }
   0x2   :  { %s2288_s20 = smov 0   ;;  %s2290_s21 = smov 0  }
   0x3   :  { %s2292_s22 = smov 0   ;;  %s2294_s23 = smov 0  }
   0x4 LB: > { %s1767_s24 = sadd.s32 4294967295, %s2249_s23   ;;  %s1768_s25 = sadd.s32 4294967294, %s2249_s23   ;;  %s2249_s23 = sphi %s2294_s23, %s18_s23   ;;  %s2245_s22 = sphi %s2292_s22, %s3610_s22   ;;  %s2241_s21 = sphi %s2290_s21, %s3609_s21   ;;  %s2237_s20 = sphi %s2288_s20, %s3608_s20   ;;  %s2233_s19 = sphi %s2286_s19, %s3607_s19   ;;  %s2229_s18 = sphi %s2284_s18, %s3606_s18  }
   0x5   : > { %s30_s26 = sadd.s32 1, %s2245_s22  ;;  %s151_s27 = sadd.s32 1, %s2237_s20 }
   0x6   : > { %p32_p0 = scmp.ge.s32.totalorder %s30_s26, 2  ;;  %p161_p1 = scmp.ne.s32.totalorder %s2237_s20, %s2233_s19 }
   0x7   : > { %p162_p2 = scmp.eq.s32.totalorder %s1767_s24, 1  ;;  %p167_p3 = scmp.ne.s32.totalorder %s2233_s19, %s2229_s18 }
   0x8   : > { %s3612_s26 = smov (%p32_p0, %s30_s26), 0  ;;  %p168_p5 = scmp.eq.s32.totalorder %s1768_s25, 1 }
   0x9   : > { %p2324_p4 = por %p162_p2, %p161_p1  ;;  %s146_s29 = ssub.s32 %s2245_s22, %s3612_s26 }
   0xa   : > { %p1771_p6 = scmp.ge.s32.totalorder %s2249_s23, 1  ;;  %p149_p7 = scmp.eq.s32.totalorder %s146_s29, 0 }
   0xb   : > { %p2331_p8 = por %p168_p5, %p167_p3  ;;  %p211_p9 = scmp.lt.s32.totalorder %s2249_s23, 3 }
   0xc   : > { %s2337_s6 = scalar_select %p149_p7, %s2237_s20, %s151_s27  }
   0xd   : > { %p212_p10 = pnand %p1771_p6, %p211_p9 }
   0xf   : > { %215 = sbr.rel (%p212_p10) target bundleno = 676 (0x2a4), region = 40 }
  0x14   : > { %v325_v0 = vld [vmem:[%s3504_s2 + $0xf0] sm:$0xff]  ;;  %v307_v2 = vld [vmem:[%s3504_s2 + $0x60] sm:$0xff]  ;;  %p244_p11 = scmp.lt.s32.totalorder %s2241_s21, 1  ;;  %v2251_v3 = vmov 0   ;;  %v326_v4 = vld [vmem:[%s3504_s2 + $0xf8] sm:$0xff]  ;;  %vm607_vm0 = vcmask 523264  }
  0x15   : > { %v309_v1 = vld [vmem:[%s3504_s2 + $0x70] sm:$0xff]  ;;  %2042 = vset.pattern.permute.xlu2 %v2251_v3  ;;  %2041 = vset.pattern.permute.xlu1 %v2251_v3  ;;  %v310_v8 = vld [vmem:[%s3504_s2 + $0x78] sm:$0xff]  ;;  %v308_v14 = vld [vmem:[%s3504_s2 + $0x68] sm:$0xff]  ;;  %s240_s29 = sand.u32 1, %s2233_s19   ;;  %s1973_s9 = sshll.u32 %s2241_s21, 6 }
  0x16   : > { %2040 = vset.pattern.permute.xlu0 %v2251_v3  ;;  %479 = vperm.xlu1 %2041, %v325_v0   ;;  %s245_s13 = scalar_select %p244_p11, %s2241_s21, 1  ;;  %v324_v27 = vld [vmem:[%s3504_s2 + $0xe8] sm:$0xff]  ;;  %v323_v30 = vld [vmem:[%s3504_s2 + $0xe0] sm:$0xff]  ;;  %v305_v31 = vld [vmem:[%s3504_s2 + $0x50] sm:$0xff] }
  0x17   : > { %399 = vperm.xlu0 %2040, %v309_v1   ;;  %389 = vperm.xlu2 %2042, %v307_v2   ;;  %v1949_v34 = vld [vmem:[%s3503_s1] sm:$0xff]  ;;  %v321_v35 = vld [vmem:[%s3504_s2 + $0xd0] sm:$0xff]  ;;  %v306_v36 = vld [vmem:[%s3504_s2 + $0x58] sm:$0xff]  ;;  %s1772_s7 = sshll.u32 %s240_s29, 6  ;;  %s1684_s12 = scalar_lea.hbm %s3507_s5, %s1973_s9 }
  0x18   : > { %s1940_s14 = sshll.u32 %s245_s13, 6  ;;  %v322_v37 = vld [vmem:[%s3504_s2 + $0xd8] sm:$0xff]  ;;  %v304_v38 = vld [vmem:[%s3504_s2 + $0x48] sm:$0xff]  ;;  %v319_v39 = vld [vmem:[%s3504_s2 + $0xc0] sm:$0xff]  ;;  %s3453_s8 = scalar_lea.vmem [#allocation2], %s1772_s7 }
  0x19   : > { %s2353_s17 = scalar_lea.vmem %s3502_s0, %s1940_s14  ;;  %v303_v40 = vld [vmem:[%s3504_s2 + $0x40] sm:$0xff]  ;;  %v1950_v41 = vld [vmem:[%s3503_s1 + $0x8] sm:$0xff]  ;;  %v301_v42 = vld [vmem:[%s3504_s2 + $0x30] sm:$0xff]  ;;  %s1685_s13 = sshll.u32 %s3453_s8, 4  ;;  %s1686_s13 = int_to_ptr.vmem [resolvable:$true] %s1685_s13 }
  0x1a   : > { %v1865_v5 = vld [vmem:[%s2353_s17 + $0x30] sm:$0xf]  ;;  %v1948_v6 = vld [vmem:[%s2353_s17 + $0x34] sm:$0xf0]  ;;  %v1947_v7 = vld [vmem:[%s2353_s17 + $0x34] sm:$0xf] }
  0x1b   : > { %v1866_v9 = vor.u32 %v1948_v6, %v1865_v5  ;;  %v1867_v10 = vld [vmem:[%s2353_s17 + $0x38] sm:$0xf0]  ;;  %v1857_v11 = vld [vmem:[%s2353_s17 + $0x20] sm:$0xf]  ;;  %v1946_v12 = vld [vmem:[%s2353_s17 + $0x24] sm:$0xf0] }
  0x1c   : > { %v1870_v13 = vor.u32 %v1947_v7, %v1867_v10  ;;  %v1945_v15 = vld [vmem:[%s2353_s17 + $0x24] sm:$0xf]  ;;  %v1859_v16 = vld [vmem:[%s2353_s17 + $0x28] sm:$0xf0]  ;;  %v1858_v17 = vor.u32 %v1946_v12, %v1857_v11  ;;  %v1849_v19 = vld [vmem:[%s2353_s17 + $0x10] sm:$0xf] }
  0x1d   : > { %660 = vmatpush.bf16.msra.mxu0 %v1866_v9  ;;  %1974 = vmatpush.bf16.msra.mxu2 %v1866_v9  ;;  %v1862_v18 = vor.u32 %v1945_v15, %v1859_v16  ;;  %v1944_v20 = vld [vmem:[%s2353_s17 + $0x14] sm:$0xf0]  ;;  %v1943_v21 = vld [vmem:[%s2353_s17 + $0x14] sm:$0xf]  ;;  %v1851_v22 = vld [vmem:[%s2353_s17 + $0x18] sm:$0xf0] }
  0x1e   : > { %749 = vmatpush.bf16.msra.mxu1 %v1870_v13  ;;  %484 = vperm.xlu1 %2041, %v326_v4   ;;  %v1850_v23 = vor.u32 %v1944_v20, %v1849_v19  ;;  %v1854_v24 = vor.u32 %v1943_v21, %v1851_v22  ;;  %v1841_v25 = vld [vmem:[%s2353_s17] sm:$0xf]  ;;  %v1942_v26 = vld [vmem:[%s2353_s17 + $0x4] sm:$0xf0]  ;;  %v1941_v28 = vld [vmem:[%s2353_s17 + $0x4] sm:$0xf] }
  0x1f   : > { %404 = vperm.xlu0 %2040, %v310_v8   ;;  %394 = vperm.xlu2 %2042, %v308_v14   ;;  %v1843_v29 = vld [vmem:[%s2353_s17 + $0x8] sm:$0xf0]  ;;  %v1842_v32 = vor.u32 %v1942_v26, %v1841_v25  ;;  %v302_v44 = vld [vmem:[%s3504_s2 + $0x38] sm:$0xff]  ;;  %v2432_v46 = vld [vmem:[%s3503_s1 + $0x60] sm:$0xff]  ;;  %s1687_s14 = sshll.u32 %s1684_s12, 4  ;;  %s1671_s15 = scalar_lea.sflag [#allocation3], %s240_s29  ;;  %s1688_s14 = int_to_ptr.hbm [resolvable:$true] %s1687_s14 }
  0x20   : > { %1978 = vmatpush.bf16.msra.mxu3 %v1870_v13  ;;  %v1846_v33 = vor.u32 %v1941_v28, %v1843_v29  ;;  %v320_v43 = vld [vmem:[%s3504_s2 + $0xc8] sm:$0xff]  ;;  %v318_v47 = vld [vmem:[%s3504_s2 + $0xb8] sm:$0xff]  ;;  %v317_v48 = vld [vmem:[%s3504_s2 + $0xb0] sm:$0xff]  ;;  %s2185_s21 = sshra.s32 %s1688_s14, 4  ;;  %s2191_s25 = scalar_lea.hbm %s3507_s5, 128  ;;  %s2186_s21 = int_to_ptr.hbm [resolvable:$true] %s2185_s21 }
  0x21   : > { %661 = vmatpush.bf16.msra.mxu0 %v1858_v17  ;;  %1975 = vmatpush.bf16.msra.mxu2 %v1858_v17  ;;  %v1962_v45 = vld [vmem:[%s3503_s1 + $0x68] sm:$0xff]  ;;  %v299_v49 = vld [vmem:[%s3504_s2 + $0x20] sm:$0xff]  ;;  %v1951_v50 = vld [vmem:[%s3503_s1 + $0x10] sm:$0xff]  ;;  %s2187_s16 = scalar_lea.hbm %s2186_s21, 64  ;;  %p2192_p1 = scmp.lt.s32.totalorder %s2186_s21, %s3507_s5 }
  0x22   : > { %750 = vmatpush.bf16.msra.mxu1 %v1862_v18  ;;  %v315_v51 = vld [vmem:[%s3504_s2 + $0xa0] sm:$0xff]  ;;  %v300_v52 = vld [vmem:[%s3504_s2 + $0x28] sm:$0xff]  ;;  %v298_v54 = vld [vmem:[%s3504_s2 + $0x18] sm:$0xff]  ;;  %p2188_p12 = scmp.ne.s32.totalorder %s2186_s21, %s2187_s16  ;;  %p2193_p2 = scmp.lt.s32.totalorder %s2191_s25, %s2187_s16 }
  0x23   : > { %v316_v53 = vld [vmem:[%s3504_s2 + $0xa8] sm:$0xff]  ;;  %v313_v55 = vld [vmem:[%s3504_s2 + $0x90] sm:$0xff]  ;;  %v1952_v57 = vld [vmem:[%s3503_s1 + $0x18] sm:$0xff] }
  0x24   : > { %1979 = vmatpush.bf16.msra.mxu3 %v1862_v18  ;;  %v297_v56 = vld [vmem:[%s3504_s2 + $0x10] sm:$0xff]  ;;  %v295_v59 = vld [vmem:[%s3504_s2] sm:$0xff]  ;;  %v296_v60 = vld [vmem:[%s3504_s2 + $0x8] sm:$0xff]  ;;  %p2189_p13 = pnand %p2188_p12, %p2324_p4  ;;  %p2194_p3 = por %p2193_p2, %p2192_p1 }
  0x25   : > { %662 = vmatpush.bf16.msra.mxu0 %v1850_v23  ;;  %1976 = vmatpush.bf16.msra.mxu2 %v1850_v23  ;;  %v1963_v58 = vld [vmem:[%s3503_s1 + $0x70] sm:$0xff]  ;;  %v1953_v61 = vld [vmem:[%s3503_s1 + $0x20] sm:$0xff]  ;;  %v1964_v62 = vld [vmem:[%s3503_s1 + $0x78] sm:$0xff] }
  0x26   : > { %751 = vmatpush.bf16.msra.mxu1 %v1854_v24  ;;  %474 = vperm.xlu1 %2041, %v324_v27   ;;  %v1954_v63 = vld [vmem:[%s3503_s1 + $0x28] sm:$0xff]  ;;  %v314_v0 = vld [vmem:[%s3504_s2 + $0x98] sm:$0xff]  ;;  %v311_v1 = vld [vmem:[%s3504_s2 + $0x80] sm:$0xff]  ;;  %p2190_p0 = pneg %p2189_p13 }
  0x27   : > { %469 = vperm.xlu0 %2040, %v323_v30   ;;  %379 = vperm.xlu2 %2042, %v305_v31   ;;  %v1955_v2 = vld [vmem:[%s3503_s1 + $0x30] sm:$0xff]  ;;  %v1451_v4 = vld [vmem:[%s3506_s4 + $0x8] sm:$0xff]  ;;  %v1454_v8 = vld [vmem:[%s3506_s4 + $0x20] sm:$0xff] }
  0x28   : > { %1980 = vmatpush.bf16.msra.mxu3 %v1854_v24  ;;  %v312_v5 = vld [vmem:[%s3504_s2 + $0x88] sm:$0xff]  ;;  %v1452_v9 = vld [vmem:[%s3506_s4 + $0x10] sm:$0xff]  ;;  %v1956_v10 = vld [vmem:[%s3503_s1 + $0x38] sm:$0xff]  ;;  %p2195_p5 = pnand %p2194_p3, %p2190_p0 }
  0x29   : > { %663 = vmatpush.bf16.msra.mxu0 %v1842_v32  ;;  %1977 = vmatpush.bf16.msra.mxu2 %v1842_v32  ;;  %v1457_v13 = vld [vmem:[%s3506_s4 + $0x38] sm:$0xff]  ;;  %v1455_v14 = vld [vmem:[%s3506_s4 + $0x28] sm:$0xff]  ;;  %v1957_v17 = vld [vmem:[%s3503_s1 + $0x40] sm:$0xff] }
  0x2a   : > { %752 = vmatpush.bf16.msra.mxu1 %v1846_v33  ;;  %v1450_v22 = vld [vmem:[%s3506_s4] sm:$0xff]  ;;  %v1453_v28 = vld [vmem:[%s3506_s4 + $0x18] sm:$0xff]  ;;  %v1958_v29 = vld [vmem:[%s3503_s1 + $0x48] sm:$0xff] }
  0x2c   : > { %1871 = vmatmul.msk.bf16.vlgmr.msra.gmra.mxu0 %vm607_vm0, %v1949_v34  ;;  %1981 = vmatpush.bf16.msra.mxu3 %v1846_v33 }
  0x2d   : > { %1887 = vmatmul.msk.bf16.vlgmr.msra.gmra.mxu1 %vm607_vm0, %v1949_v34  ;;  %1884 = vmatmul.msk.bf16.vlgmr.msra.gmra.mxu2 %vm607_vm0, %v1962_v45  ;;  %v1456_v34 = vld [vmem:[%s3506_s4 + $0x30] sm:$0xff] }
  0x2e   : > { %459 = vperm.xlu1 %2041, %v321_v35  }
  0x2f   : > { %384 = vperm.xlu0 %2040, %v306_v36   ;;  %464 = vperm.xlu2 %2042, %v322_v37  }
  0x30   : > { %1899 = vmatmul.msk.bf16.vlgmr.msra.gmra.mxu3 %vm607_vm0, %v2432_v46 }
  0x36   : > { %374 = vperm.xlu1 %2041, %v304_v38  }
  0x37   : > { %449 = vperm.xlu2 %2042, %v319_v39   ;;  %369 = vperm.xlu0 %2040, %v303_v40   ;;  %v1959_v40 = vld [vmem:[%s3503_s1 + $0x50] sm:$0xff] }
  0x3c   : > { %1872 = vmatmul.msk.bf16.gmra.mxu0 %vm607_vm0, %v1950_v41 }
  0x3d   : > { %1888 = vmatmul.msk.bf16.gmra.mxu1 %vm607_vm0, %v1950_v41  ;;  %1885 = vmatmul.msk.bf16.gmra.mxu2 %vm607_vm0, %v1963_v58 }
  0x3e   : > { %359 = vperm.xlu1 %2041, %v301_v42  }
  0x3f   : > { %454 = vperm.xlu0 %2040, %v320_v43   ;;  %364 = vperm.xlu2 %2042, %v302_v44  }
  0x40   : > { %1900 = vmatmul.msk.bf16.gmra.mxu3 %vm607_vm0, %v1962_v45 }
  0x46   : > { %444 = vperm.xlu1 %2041, %v318_v47  }
  0x47   : > { %439 = vperm.xlu0 %2040, %v317_v48   ;;  %349 = vperm.xlu2 %2042, %v299_v49  }
  0x4c   : > { %1873 = vmatmul.msk.bf16.gmra.mxu0 %vm607_vm0, %v1951_v50 }
  0x4d   : > { %1889 = vmatmul.msk.bf16.gmra.mxu1 %vm607_vm0, %v1951_v50  ;;  %1886 = vmatmul.msk.bf16.gmra.mxu2 %vm607_vm0, %v1964_v62 }
  0x4e   : > { %429 = vperm.xlu1 %2041, %v315_v51  }
  0x4f   : > { %354 = vperm.xlu0 %2040, %v300_v52   ;;  %434 = vperm.xlu2 %2042, %v316_v53  }
  0x50   : > { %1901 = vmatmul.msk.bf16.gmra.mxu3 %vm607_vm0, %v1963_v58 }
  0x56   : > { %344 = vperm.xlu1 %2041, %v298_v54  }
  0x57   : > { %419 = vperm.xlu2 %2042, %v313_v55   ;;  %339 = vperm.xlu0 %2040, %v297_v56   ;;  %v1960_v56 = vld [vmem:[%s3503_s1 + $0x58] sm:$0xff] }
  0x5c   : > { %1874 = vmatmul.msk.bf16.gmra.mxu0 %vm607_vm0, %v1952_v57 }
  0x5d   : > { %1890 = vmatmul.msk.bf16.gmra.mxu1 %vm607_vm0, %v1952_v57 }
  0x5e   : > { %329 = vperm.xlu1 %2041, %v295_v59  }
  0x5f   : > { %334 = vperm.xlu2 %2042, %v296_v60   ;;  %424 = vperm.xlu0 %2040, %v314_v0  }
  0x60   : > { %1902 = vmatmul.msk.bf16.gmra.mxu3 %vm607_vm0, %v1964_v62 }
  0x66   : > { %414 = vperm.xlu1 %2041, %v312_v5  }
  0x67   : > { %409 = vperm.xlu0 %2040, %v311_v1   ;;  %1460 = vperm.xlu2 %2042, %v1450_v22  }
  0x6c   : > { %1875 = vmatmul.msk.bf16.gmra.mxu0 %vm607_vm0, %v1953_v61 }
  0x6d   : > { %1891 = vmatmul.msk.bf16.gmra.mxu1 %vm607_vm0, %v1953_v61 }
  0x6e   : > { %1470 = vperm.xlu1 %2041, %v1452_v9  }
  0x6f   : > { %1465 = vperm.xlu0 %2040, %v1451_v4   ;;  %1475 = vperm.xlu2 %2042, %v1453_v28  }
  0x71   : > { %v2520_v6 = vpop.permute.xlu2 %389 }
  0x76   : > { %1485 = vperm.xlu1 %2041, %v1455_v14  }
  0x77   : > { %1480 = vperm.xlu0 %2040, %v1454_v8   ;;  %1490 = vperm.xlu2 %2042, %v1456_v34  }
  0x79   : > { %v2537_v12 = vpop.permute.xlu2 %394 }
  0x7c   : > { %1876 = vmatmul.msk.bf16.gmra.mxu0 %vm607_vm0, %v1954_v63 }
  0x7d   : > { %1892 = vmatmul.msk.bf16.gmra.mxu1 %vm607_vm0, %v1954_v63 }
  0x7f   : > { %1495 = vperm.xlu0 %2040, %v1457_v13  }
  0x81   : > { %v2552_v18 = vpop.permute.xlu2 %379 }
  0x88   : > { %v2534_v11 = vpop.permute.xlu1 %479 }
  0x89   : > { %v2511_v3 = vpop.permute.xlu0 %399  ;;  %3533 = vst [vmem:[#allocation5_spill] sm:$0xff] %v2534_v11  ;;  %v2571_v26 = vpop.permute.xlu2 %464 }
  0x8a   : > { %3537 = vst [vmem:[#allocation9_spill] sm:$0xff] %v2571_v26 }
  0x8c   : > { %1877 = vmatmul.msk.bf16.gmra.mxu0 %vm607_vm0, %v1955_v2 }
  0x8d   : > { %1893 = vmatmul.msk.bf16.gmra.mxu1 %vm607_vm0, %v1955_v2 }
  0x90   : > { %v2547_v16 = vpop.permute.xlu1 %484 }
  0x91   : > { %v2522_v7 = vpop.permute.xlu0 %404  ;;  %3535 = vst [vmem:[#allocation7_spill] sm:$0xff] %v2547_v16  ;;  %v2586_v33 = vpop.permute.xlu2 %449 }
  0x92   : > { %3539 = vst [vmem:[#allocation11_spill] sm:$0xff] %v2586_v33 }
  0x98   : > { %v2565_v23 = vpop.permute.xlu1 %474 }
  0x99   : > { %v2545_v15 = vpop.permute.xlu0 %469  ;;  %3536 = vst [vmem:[#allocation8_spill] sm:$0xff] %v2565_v23  ;;  %v2598_v39 = vpop.permute.xlu2 %364 }
  0x9a   : > { %3534 = vst [vmem:[#allocation6_spill] sm:$0xff] %v2545_v15 }
  0x9c   : > { %1878 = vmatmul.msk.bf16.gmra.mxu0 %vm607_vm0, %v1956_v10 }
  0x9d   : > { %1894 = vmatmul.msk.bf16.gmra.mxu1 %vm607_vm0, %v1956_v10 }
  0xa0   : > { %v2583_v32 = vpop.permute.xlu1 %459 }
  0xa1   : > { %v2558_v21 = vpop.permute.xlu0 %384  ;;  %3538 = vst [vmem:[#allocation10_spill] sm:$0xff] %v2583_v32  ;;  %v2613_v47 = vpop.permute.xlu2 %349 }
  0xa8   : > { %v2596_v38 = vpop.permute.xlu1 %374 }
  0xa9   : > { %v2554_v19 = vpop.f32.mrf.mxu0  ;;  %v2573_v27 = vpop.permute.xlu0 %369 }
  0xaa   : > { %v2556_v20 = vpop.f32.mrf.mxu1  ;;  %v2642_v9 = vpop.permute.xlu2 %434 }
  0xab   : > { %3544 = vst [vmem:[#allocation16_spill] sm:$0xff] %v2642_v9 }
  0xac   : > { %1879 = vmatmul.msk.bf16.gmra.mxu0 %vm607_vm0, %v1957_v17 }
  0xad   : > { %1895 = vmatmul.msk.bf16.gmra.mxu1 %vm607_vm0, %v1957_v17 }
  0xb0   : > { %v2609_v44 = vpop.f32.mrf.mxu2  ;;  %v2611_v45 = vpop.permute.xlu1 %359 }
  0xb1   : > { %v2567_v24 = vpop.f32.mrf.mxu0  ;;  %v2592_v35 = vpop.permute.xlu0 %454  ;;  %v2709_v9 = vadd.f32 %v2609_v44, %v2583_v32 }
  0xb2   : > { %v2569_v25 = vpop.f32.mrf.mxu1  ;;  %3540 = vst [vmem:[#allocation12_spill] sm:$0xff] %v2592_v35 }
  0xb8   : > { %v2623_v54 = vpop.f32.mrf.mxu2  ;;  %v2630_v57 = vpop.permute.xlu1 %444 }
  0xb9   : > { %v670_v30 = vpop.f32.mrf.mxu0  ;;  %v2603_v41 = vpop.permute.xlu0 %439  ;;  %3542 = vst [vmem:[#allocation14_spill] sm:$0xff] %v2630_v57 }
  0xba   : > { %v2581_v31 = vpop.f32.mrf.mxu1  ;;  %3541 = vst [vmem:[#allocation13_spill] sm:$0xff] %v2603_v41 }
  0xbc   : > { %1880 = vmatmul.msk.bf16.gmra.mxu0 %vm607_vm0, %v1958_v29 }
  0xbd   : > { %1896 = vmatmul.msk.bf16.gmra.mxu1 %vm607_vm0, %v1958_v29 }
  0xc0   : > { %v735_v63 = vpop.f32.mrf.mxu2  ;;  %v2640_v8 = vpop.permute.xlu1 %429 }
  0xc1   : > { %v672_v36 = vpop.f32.mrf.mxu0  ;;  %v2617_v50 = vpop.permute.xlu0 %354  ;;  %3543 = vst [vmem:[#allocation15_spill] sm:$0xff] %v2640_v8 }
  0xc2   : > { %v2594_v37 = vpop.f32.mrf.mxu1 }
  0xc8   : > { %v737_v13 = vpop.f32.mrf.mxu2  ;;  %v2652_v29 = vpop.permute.xlu1 %344 }
  0xc9   : > { %v675_v42 = vpop.f32.mrf.mxu0  ;;  %v2648_v28 = vpop.permute.xlu0 %339 }
  0xca   : > { %v2605_v43 = vpop.f32.mrf.mxu1  ;;  %v2620_v51 = vadd.f32 %v675_v42, %v2613_v47  ;;  %v2654_v42 = vpop.permute.xlu2 %419 }
  0xcb   : > { %3546 = vst [vmem:[#allocation18_spill] sm:$0xff] %v2654_v42 }
  0xcc   : > { %1881 = vmatmul.msk.bf16.gmra.mxu0 %vm607_vm0, %v1959_v40  ;;  %v842_v55 = vmul.f32 %v2620_v51, %v2620_v51 }
  0xcd   : > { %1897 = vmatmul.msk.bf16.gmra.mxu1 %vm607_vm0, %v1959_v40 }
  0xce   : > { %v906_v61 = vmul.f32 %v842_v55, %v2620_v51  ;;  %v2660_v55 = vadd.f32 %v672_v36, %v2652_v29 }
  0xd0   : > { %v970_v0 = vmul.f32 0.044715, %v906_v61  ;;  %v740_v34 = vpop.f32.mrf.mxu2 }
  0xd1   : > { %v677_v48 = vpop.f32.mrf.mxu0 }
  0xd2   : > { %v2615_v49 = vpop.f32.mrf.mxu1  ;;  %v678_v52 = vadd.f32 %v677_v48, %v2617_v50  ;;  %v1034_v5 = vadd.f32 %v970_v0, %v2620_v51  ;;  %v2657_v48 = vadd.f32 %v670_v30, %v2648_v28  ;;  %v840_v0 = vmul.f32 %v2660_v55, %v2660_v55  ;;  %v335_v42 = vpop.permute.xlu2 %334 }
  0xd4   : > { %v844_v53 = vmul.f32 %v678_v52, %v678_v52  ;;  %v1098_v14 = vmul.f32 0.7978846, %v1034_v5  ;;  %v904_v8 = vmul.f32 %v840_v0, %v2660_v55 }
  0xd6   : > { %v908_v58 = vmul.f32 %v844_v53, %v678_v52 }
  0xd8   : > { %v972_v62 = vmul.f32 0.044715, %v908_v58  ;;  %v742_v30 = vpop.f32.mrf.mxu2 }
  0xd9   : > { %v680_v59 = vpop.f32.mrf.mxu0 }
  0xda   : > { %v2632_v60 = vpop.f32.mrf.mxu1  ;;  %v1036_v1 = vadd.f32 %v972_v62, %v678_v52 }
  0xdc   : > { %1882 = vmatmul.msk.bf16.gmra.mxu0 %vm607_vm0, %v1960_v56  ;;  %v1100_v10 = vmul.f32 0.7978846, %v1036_v1 }
  0xdd   : > { %1898 = vmatmul.msk.bf16.gmra.mxu1 %vm607_vm0, %v1960_v56 }
  0xde   : > { %2043 = vtanh.f32 %v1100_v10  ;;  %v2675_v10 = vadd.f32 %v680_v59, %v2611_v45 }
  0xdf   : > { %2045 = vtanh.f32 %v1098_v14  ;;  %v2678_v14 = vadd.f32 %v740_v34, %v2534_v11 }
  0xe0   : > { %v846_v11 = vmul.f32 %v2675_v10, %v2675_v10 }
  0xe1   : > { %v682_v2 = vpop.f32.mrf.mxu0  ;;  %v894_v59 = vmul.f32 %v2678_v14, %v2678_v14 }
  0xe2   : > { %v2637_v4 = vpop.f32.mrf.mxu1  ;;  %v2671_v1 = vadd.f32 %v682_v2, %v2598_v39 }
  0xe3   : > { %v958_v41 = vmul.f32 %v894_v59, %v2678_v14 }
  0xe4   : > { %v2044_v40 = vpop.eup %2043  ;;  %v848_v2 = vmul.f32 %v2671_v1, %v2671_v1 }
  0xe5   : > { %v2046_v53 = vpop.eup %2045  ;;  %v1228_v61 = vadd.f32 1.0, %v2044_v40  ;;  %v2681_v40 = vadd.f32 %v742_v30, %v2547_v16  ;;  %v2696_v30 = vadd.f32 %v737_v13, %v2565_v23  ;;  %v2703_v16 = vadd.f32 %v2569_v25, %v335_v42 }
  0xe6   : > { %v1226_v62 = vadd.f32 1.0, %v2046_v53  ;;  %v2719_v25 = vadd.f32 %v2623_v54, %v2571_v26  ;;  %v1022_v23 = vmul.f32 0.044715, %v958_v41 }
  0xe7   : > { %v1292_v5 = vmul.f32 0.5, %v1228_v61  ;;  %v2687_v61 = vadd.f32 %v735_v63, %v2545_v15  ;;  %3550 = vst [vmem:[#allocation22_spill] sm:$0xff] %v2703_v16  ;;  %v892_v44 = vmul.f32 %v2696_v30, %v2696_v30 }
  0xe8   : > { %v1290_v53 = vmul.f32 0.5, %v1226_v62  ;;  %v896_v62 = vmul.f32 %v2681_v40, %v2681_v40  ;;  %v1086_v54 = vadd.f32 %v1022_v23, %v2678_v14  ;;  %v888_v41 = vmul.f32 %v2719_v25, %v2719_v25 }
  0xe9   : > { %v2644_v17 = vpop.f32.mrf.mxu0  ;;  %v2700_v0 = vmul.f32 %v1292_v5, %v678_v52  ;;  %v968_v52 = vmul.f32 0.044715, %v904_v8  ;;  %v912_v5 = vmul.f32 %v848_v2, %v2671_v1  ;;  %v837_v2 = vmul.f32 %v2703_v16, %v2703_v16 }
  0xea   : > { %v2646_v22 = vpop.f32.mrf.mxu1  ;;  %v960_v13 = vmul.f32 %v896_v62, %v2681_v40  ;;  %v2714_v57 = vmul.f32 %v1290_v53, %v2620_v51  ;;  %v910_v51 = vmul.f32 %v846_v11, %v2675_v10  ;;  %v886_v53 = vmul.f32 %v2709_v9, %v2709_v9 }
  0xeb   : > { %3545 = vst [vmem:[#allocation17_spill] sm:$0xff] %v2646_v22  ;;  %v976_v15 = vmul.f32 0.044715, %v912_v5  ;;  %v956_v11 = vmul.f32 %v892_v44, %v2696_v30  ;;  %v1032_v26 = vadd.f32 %v968_v52, %v2660_v55  ;;  %v2745_v23 = vadd.f32 %v2567_v24, %v335_v42 }
  0xec   : > { %1883 = vmatmul.msk.bf16.gmra.mxu0 %vm607_vm0, %v2432_v46  ;;  %v838_v46 = vmul.f32 %v2657_v48, %v2657_v48  ;;  %3549 = vst [vmem:[#allocation21_spill] sm:$0xff] %v2700_v0  ;;  %v1024_v59 = vmul.f32 0.044715, %v960_v13  ;;  %v1150_v0 = vmul.f32 0.7978846, %v1086_v54  ;;  %v901_v32 = vmul.f32 %v837_v2, %v2703_v16 }
  0xed   : > { %3551 = vst [vmem:[#allocation23_spill] sm:$0xff] %v2714_v57  ;;  %v974_v57 = vmul.f32 0.044715, %v910_v51  ;;  %v1040_v33 = vadd.f32 %v976_v15, %v2671_v1  ;;  %v1020_v44 = vmul.f32 0.044715, %v956_v11  ;;  %v836_v52 = vmul.f32 %v2745_v23, %v2745_v23 }
  0xee   : > { %v902_v36 = vmul.f32 %v838_v46, %v2657_v48  ;;  %v2755_v24 = vadd.f32 %v2605_v43, %v2613_v47  ;;  %v2760_v51 = vadd.f32 %v2594_v37, %v2652_v29  ;;  %v965_v43 = vmul.f32 0.044715, %v901_v32 }
  0xef   : > { %v1038_v42 = vadd.f32 %v974_v57, %v2675_v10  ;;  %v1084_v57 = vadd.f32 %v1020_v44, %v2696_v30  ;;  %v900_v37 = vmul.f32 %v836_v52, %v2745_v23 }
  0xf0   : > { %v966_v63 = vmul.f32 0.044715, %v902_v36  ;;  %v890_v36 = vmul.f32 %v2687_v61, %v2687_v61  ;;  %3553 = vst [vmem:[#allocation25_spill] sm:$0xff] %v2755_v24  ;;  %v843_v29 = vmul.f32 %v2755_v24, %v2755_v24 }
  0xf1   : > { %v2662_v56 = vpop.f32.mrf.mxu0  ;;  %3554 = vst [vmem:[#allocation26_spill] sm:$0xff] %v2760_v51 }
  0xf2   : > { %v2664_v58 = vpop.f32.mrf.mxu1  ;;  %v1030_v8 = vadd.f32 %v966_v63, %v2657_v48  ;;  %v954_v35 = vmul.f32 %v890_v36, %v2687_v61  ;;  %v1088_v63 = vadd.f32 %v1024_v59, %v2681_v40  ;;  %v950_v36 = vmul.f32 %v886_v53, %v2709_v9 }
  0xf3   : > { %3547 = vst [vmem:[#allocation19_spill] sm:$0xff] %v2664_v58  ;;  %v1096_v59 = vmul.f32 0.7978846, %v1032_v26  ;;  %v330_v26 = vpop.permute.xlu1 %329  ;;  %v1104_v53 = vmul.f32 0.7978846, %v1040_v33 }
  0xf4   : > { %v1094_v5 = vmul.f32 0.7978846, %v1030_v8  ;;  %v1018_v58 = vmul.f32 0.044715, %v954_v35  ;;  %v1014_v15 = vmul.f32 0.044715, %v950_v36  ;;  %v2764_v35 = vadd.f32 %v2581_v31, %v2648_v28 }
  0xf5   : > { %v1102_v31 = vmul.f32 0.7978846, %v1038_v42  ;;  %v841_v28 = vmul.f32 %v2760_v51, %v2760_v51  ;;  %v2783_v36 = vmul.f32 0.044715, %v900_v37  ;;  %v2795_v22 = vadd.f32 %v2556_v20, %v330_v26 }
  0xf6   : > { %2047 = vtanh.f32 %v1094_v5  ;;  %v1082_v8 = vadd.f32 %v1018_v58, %v2687_v61  ;;  %v2776_v58 = vadd.f32 %v2554_v19, %v330_v26  ;;  %v1078_v32 = vadd.f32 %v1014_v15, %v2709_v9 }
  0xf7   : > { %2049 = vtanh.f32 %v1150_v0  ;;  %v907_v19 = vmul.f32 %v843_v29, %v2755_v24  ;;  %v905_v52 = vmul.f32 %v841_v28, %v2760_v51 }
  0xf8   : > { %v1146_v0 = vmul.f32 0.7978846, %v1082_v8  ;;  %v834_v42 = vmul.f32 %v2776_v58, %v2776_v58  ;;  %v1142_v8 = vmul.f32 0.7978846, %v1078_v32  ;;  %v2799_v32 = vadd.f32 %v2615_v49, %v2617_v50 }
  0xf9   : > { %v2691_v46 = vpop.f32.mrf.mxu0  ;;  %v971_v28 = vmul.f32 0.044715, %v907_v19 }
  0xfa   : > { %v2693_v34 = vpop.f32.mrf.mxu1  ;;  %3555 = vst [vmem:[#allocation27_spill] sm:$0xff] %v2799_v32 }
  0xfb   : > { %3548 = vst [vmem:[#allocation20_spill] sm:$0xff] %v2693_v34  ;;  %v1152_v34 = vmul.f32 0.7978846, %v1088_v63  ;;  %v1148_v63 = vmul.f32 0.7978846, %v1084_v57 }
  0xfc   : > { %v2048_v33 = vpop.eup %2047 }
  0xfd   : > { %2051 = vtanh.f32 %v1152_v34  ;;  %v839_v34 = vmul.f32 %v2764_v35, %v2764_v35 }
  0xfe   : > { %2053 = vtanh.f32 %v1096_v59 }
  0xff   : > { %2055 = vtanh.f32 %v1104_v53  ;;  %v903_v53 = vmul.f32 %v839_v34, %v2764_v35 }
 0x100   : > { %2057 = vtanh.f32 %v1102_v31 }
 0x101   : > { %v2737_v13 = vpop.f32.mrf.mxu0  ;;  %2059 = vtanh.f32 %v1146_v0 }
 0x102   : > { %v2739_v62 = vpop.f32.mrf.mxu1  ;;  %2061 = vtanh.f32 %v1148_v63  ;;  %v2804_v63 = vmul.f32 0.044715, %v905_v52 }
 0x103   : > { %3552 = vst [vmem:[#allocation24_spill] sm:$0xff] %v2739_v62  ;;  %v952_v62 = vmul.f32 %v888_v41, %v2719_v25  ;;  %v1029_v41 = vadd.f32 %v965_v43, %v2703_v16  ;;  %2063 = vtanh.f32 %v1142_v8 }
 0x105   : > { %v1016_v47 = vmul.f32 0.044715, %v952_v62  ;;  %v2050_v62 = vpop.eup %2049  ;;  %v2790_v57 = vmul.f32 0.7978846, %v1029_v41 }
 0x106   : > { %v2052_v5 = vpop.eup %2051  ;;  %v1278_v44 = vadd.f32 1.0, %v2050_v62 }
 0x107   : > { %v1080_v11 = vadd.f32 %v1016_v47, %v2719_v25  ;;  %v2054_v59 = vpop.eup %2053  ;;  %v1280_v15 = vadd.f32 1.0, %v2052_v5  ;;  %v1222_v47 = vadd.f32 1.0, %v2048_v33  ;;  %v898_v33 = vmul.f32 %v834_v42, %v2776_v58 }
 0x108   : > { %v1342_v43 = vmul.f32 0.5, %v1278_v44  ;;  %v2056_v62 = vpop.eup %2055  ;;  %v1224_v34 = vadd.f32 1.0, %v2054_v59  ;;  %v2819_v59 = vadd.f32 %v2737_v13, %v2558_v21 }
 0x109   : > { %v695_v54 = vpop.f32.mrf.mxu0  ;;  %v1344_v29 = vmul.f32 0.5, %v1280_v15  ;;  %v1144_v31 = vmul.f32 0.7978846, %v1080_v11  ;;  %v2058_v5 = vpop.eup %2057  ;;  %v2806_v11 = vmul.f32 0.044715, %v903_v53  ;;  %v1286_v26 = vmul.f32 0.5, %v1222_v47 }
 0x10a   : > { %v2768_v2 = vpop.f32.mrf.mxu1  ;;  %v1406_v0 = vmul.f32 %v1342_v43, %v2678_v14  ;;  %v2812_v49 = vadd.f32 %v695_v54, %v2520_v6  ;;  %v1232_v19 = vadd.f32 1.0, %v2056_v62  ;;  %v2060_v44 = vpop.eup %2059  ;;  %v1035_v14 = vadd.f32 %v971_v28, %v2755_v24 }
 0x10b   : > { %v1408_v41 = vmul.f32 %v1344_v29, %v2681_v40  ;;  %3556 = vst [vmem:[#allocation28_spill] sm:$0xff] %v2806_v11  ;;  %2065 = vtanh.f32 %v1144_v31  ;;  %v835_v40 = vmul.f32 %v2795_v22, %v2795_v22  ;;  %v1288_v52 = vmul.f32 0.5, %v1224_v34  ;;  %v2062_v42 = vpop.eup %2061  ;;  %v2868_v11 = vpop.f32.mrf.mxu3 }
 0x10c   : > { %v962_v15 = vmul.f32 0.044715, %v898_v33  ;;  %v845_v54 = vmul.f32 %v2799_v32, %v2799_v32  ;;  %v1274_v8 = vadd.f32 1.0, %v2060_v44  ;;  %v1230_v53 = vadd.f32 1.0, %v2058_v5  ;;  %v2064_v29 = vpop.eup %2063 }
 0x10d   : > { %v1448_v50 = vpack.c.bf16 %v1408_v41, %v1406_v0  ;;  %v2825_v43 = vadd.f32 %v2644_v17, %v2573_v27  ;;  %v2829_v47 = vadd.f32 %v2691_v46, %v2552_v18  ;;  %v858_v31 = vmul.f32 %v2812_v49, %v2812_v49 }
 0x10e   : > { %v1338_v28 = vmul.f32 0.5, %v1274_v8  ;;  %v1296_v34 = vmul.f32 0.5, %v1232_v19  ;;  %v2836_v33 = vmul.f32 %v1286_v26, %v2657_v48  ;;  %v2840_v17 = vadd.f32 %v2662_v56, %v2596_v38 }
 0x10f   : > { %1567 = vmatpush.bf16.msrb.mxu3 %v1448_v50  ;;  %v856_v46 = vmul.f32 %v2819_v59, %v2819_v59  ;;  %v2848_v41 = vmul.f32 %v1288_v52, %v2660_v55  ;;  %v1270_v26 = vadd.f32 1.0, %v2064_v29  ;;  %v1294_v44 = vmul.f32 0.5, %v1230_v53 }
 0x110   : > { %v1402_v48 = vmul.f32 %v1338_v28, %v2687_v61  ;;  %v854_v56 = vmul.f32 %v2829_v47, %v2829_v47  ;;  %v922_v55 = vmul.f32 %v858_v31, %v2812_v49  ;;  %v909_v61 = vmul.f32 %v845_v54, %v2799_v32 }
 0x111   : > { %v697_v37 = vpop.f32.mrf.mxu0  ;;  %v2066_v5 = vpop.eup %2065  ;;  %v1334_v24 = vmul.f32 0.5, %v1270_v26  ;;  %v920_v53 = vmul.f32 %v856_v46, %v2819_v59 }
 0x112   : > { %v2792_v16 = vpop.f32.mrf.mxu1  ;;  %v2809_v20 = vadd.f32 %v697_v37, %v2537_v12  ;;  %v1276_v37 = vadd.f32 1.0, %v2062_v42  ;;  %v986_v26 = vmul.f32 0.044715, %v922_v55  ;;  %v1026_v55 = vadd.f32 %v962_v15, %v2776_v58 }
 0x113   : > { %v1398_v31 = vmul.f32 %v1334_v24, %v2709_v9  ;;  %v984_v24 = vmul.f32 0.044715, %v920_v53 }
 0x114   : > { %v860_v13 = vmul.f32 %v2809_v20, %v2809_v20  ;;  %v1340_v19 = vmul.f32 0.5, %v1276_v37  ;;  %v2861_v37 = vmul.f32 %v1296_v34, %v2671_v1  ;;  %v852_v1 = vmul.f32 %v2840_v17, %v2840_v17 }
 0x115   : > { %v1048_v15 = vadd.f32 %v984_v24, %v2819_v59 }
 0x116   : > { %v924_v42 = vmul.f32 %v860_v13, %v2809_v20  ;;  %v1404_v52 = vmul.f32 %v1340_v19, %v2696_v30  ;;  %v850_v13 = vmul.f32 %v2825_v43, %v2825_v43  ;;  %v2872_v30 = vmul.f32 %v1294_v44, %v2675_v10 }
 0x117   : > { %v918_v19 = vmul.f32 %v854_v56, %v2829_v47  ;;  %v1099_v10 = vmul.f32 0.7978846, %v1035_v14 }
 0x118   : > { %v988_v54 = vmul.f32 0.044715, %v924_v42  ;;  %v914_v56 = vmul.f32 %v850_v13, %v2825_v43  ;;  %v1090_v13 = vmul.f32 0.7978846, %v1026_v55  ;;  %v2907_v55 = vpop.f32.mrf.mxu3 }
 0x119   : > { %v700_v62 = vpop.f32.mrf.mxu0  ;;  %v982_v53 = vmul.f32 0.044715, %v918_v19  ;;  %2067 = vtanh.f32 %v1099_v10  ;;  %3557 = vst [vmem:[#allocation29_spill] sm:$0xff] %v2907_v55 }
 0x11a   : > { %v2845_v0 = vadd.f32 %v700_v62, %v2511_v3  ;;  %v2850_v50 = vpop.f32.mrf.mxu1  ;;  %v1272_v62 = vadd.f32 1.0, %v2066_v5  ;;  %v1446_v5 = vpack.c.bf16 %v1404_v52, %v1402_v48  ;;  %v973_v52 = vmul.f32 0.044715, %v909_v61 }
 0x11b   : > { %v1046_v24 = vadd.f32 %v982_v53, %v2829_v47  ;;  %2069 = vtanh.f32 %v1090_v13 }
 0x11c   : > { %v862_v8 = vmul.f32 %v2845_v0, %v2845_v0  ;;  %v1336_v28 = vmul.f32 0.5, %v1272_v62  ;;  %1568 = vmatpush.bf16.msrb.mxu3 %v1446_v5  ;;  %v1050_v5 = vadd.f32 %v986_v26, %v2812_v49  ;;  %v1037_v10 = vadd.f32 %v973_v52, %v2799_v32 }
 0x11e   : > { %v926_v29 = vmul.f32 %v862_v8, %v2845_v0  ;;  %v1400_v46 = vmul.f32 %v1336_v28, %v2719_v25  ;;  %v899_v25 = vmul.f32 %v835_v40, %v2795_v22  ;;  %v1052_v28 = vadd.f32 %v988_v54, %v2809_v20 }
 0x11f   : > { %v1028_v40 = vadd.f32 %v2783_v36, %v2745_v23  ;;  %v2900_v54 = vadd.f32 %v2632_v60, %v2611_v45  ;;  %v2913_v45 = vadd.f32 %v2850_v50, %v2511_v3  ;;  %v1101_v53 = vmul.f32 0.7978846, %v1037_v10 }
 0x120   : > { %v990_v34 = vmul.f32 0.044715, %v926_v29  ;;  %v1444_v62 = vpack.c.bf16 %v1400_v46, %v1398_v31  ;;  %v916_v29 = vmul.f32 %v852_v1, %v2840_v17  ;;  %v963_v1 = vmul.f32 0.044715, %v899_v25 }
 0x121   : > { %v702_v8 = vpop.f32.mrf.mxu0  ;;  %v978_v46 = vmul.f32 0.044715, %v914_v56  ;;  %v1092_v19 = vmul.f32 0.7978846, %v1028_v40  ;;  %v1116_v36 = vmul.f32 0.7978846, %v1052_v28  ;;  %v847_v52 = vmul.f32 %v2900_v54, %v2900_v54  ;;  %v2920_v28 = vpop.eup %2067 }
 0x122   : > { %v1054_v44 = vadd.f32 %v990_v34, %v2845_v0  ;;  %v2884_v42 = vadd.f32 %v702_v8, %v2522_v7  ;;  %v791_v34 = vpop.f32.mrf.mxu1  ;;  %1569 = vmatpush.bf16.msrb.mxu3 %v1444_v62  ;;  %v980_v26 = vmul.f32 0.044715, %v916_v29  ;;  %v1114_v25 = vmul.f32 0.7978846, %v1050_v5 }
 0x123   : > { %v2903_v62 = vadd.f32 %v791_v34, %v2522_v7  ;;  %v1112_v7 = vmul.f32 0.7978846, %v1048_v15  ;;  %v1027_v56 = vadd.f32 %v963_v1, %v2795_v22  ;;  %v1042_v29 = vadd.f32 %v978_v46, %v2825_v43 }
 0x124   : > { %v864_v14 = vmul.f32 %v2884_v42, %v2884_v42  ;;  %v1118_v31 = vmul.f32 0.7978846, %v1054_v44  ;;  %v2927_v5 = vadd.f32 %v2637_v4, %v2598_v39  ;;  %v2931_v34 = vadd.f32 %v2768_v2, %v2520_v6 }
 0x125   : > { %v865_v3 = vmul.f32 %v2903_v62, %v2903_v62  ;;  %v2935_v40 = vadd.f32 %v2792_v16, %v2537_v12  ;;  %v863_v13 = vmul.f32 %v2913_v45, %v2913_v45  ;;  %v1110_v15 = vmul.f32 0.7978846, %v1046_v24 }
 0x126   : > { %v928_v61 = vmul.f32 %v864_v14, %v2884_v42  ;;  %2071 = vtanh.f32 %v1118_v31  ;;  %v1044_v14 = vadd.f32 %v980_v26, %v2840_v17  ;;  %v2941_v31 = vadd.f32 %v2804_v63, %v2760_v51  ;;  %v3559_v63 = vld [vmem:[#allocation17_spill] sm:$0xff] }
 0x127   : > { %2073 = vtanh.f32 %v1092_v19  ;;  %v2943_v39 = vmul.f32 0.7978846, %v1027_v56  ;;  %v1106_v6 = vmul.f32 0.7978846, %v1042_v29  ;;  %v2946_v2 = vmul.f32 %v847_v52, %v2900_v54  ;;  %v2966_v52 = vpop.f32.mrf.mxu3 }
 0x128   : > { %v992_v8 = vmul.f32 0.044715, %v928_v61  ;;  %2075 = vtanh.f32 %v1116_v36  ;;  %v2070_v61 = vpop.eup %2069  ;;  %v929_v12 = vmul.f32 %v865_v3, %v2903_v62  ;;  %v1108_v16 = vmul.f32 0.7978846, %v1044_v14  ;;  %v3562_v3 = vld [vmem:[#allocation19_spill] sm:$0xff] }
 0x129   : > { %v2909_v44 = vpop.f32.mrf.mxu0  ;;  %2077 = vtanh.f32 %v1114_v25  ;;  %v1218_v1 = vadd.f32 1.0, %v2070_v61  ;;  %v849_v19 = vmul.f32 %v2927_v5, %v2927_v5  ;;  %v2953_v26 = vadd.f32 %v3559_v63, %v2573_v27 }
 0x12a   : > { %3558 = vst [vmem:[#allocation30_spill] sm:$0xff] %v2909_v44  ;;  %v1056_v60 = vadd.f32 %v992_v8, %v2884_v42  ;;  %2079 = vtanh.f32 %v1112_v7  ;;  %v3560_v8 = vld [vmem:[#allocation20_spill] sm:$0xff]  ;;  %v859_v25 = vmul.f32 %v2931_v34, %v2931_v34  ;;  %v927_v7 = vmul.f32 %v863_v13, %v2913_v45 }
 0x12b   : > { %v2957_v36 = vadd.f32 %v3560_v8, %v2552_v18  ;;  %v1282_v18 = vmul.f32 0.5, %v1218_v1  ;;  %v993_v63 = vmul.f32 0.044715, %v929_v12  ;;  %v2978_v8 = vpop.f32.mrf.mxu1  ;;  %v913_v12 = vmul.f32 %v849_v19, %v2927_v5 }
 0x12c   : > { %v1120_v50 = vmul.f32 0.7978846, %v1056_v60  ;;  %v2072_v4 = vpop.eup %2071  ;;  %v861_v60 = vmul.f32 %v2935_v40, %v2935_v40  ;;  %3564 = vst [vmem:[#allocation20_spill] sm:$0xff] %v2978_v8 }
 0x12d   : > { %v2074_v46 = vpop.eup %2073  ;;  %v1246_v27 = vadd.f32 1.0, %v2072_v4  ;;  %v2981_v1 = vmul.f32 %v1282_v18, %v2776_v58 }
 0x12e   : > { %2081 = vtanh.f32 %v1120_v50  ;;  %v2076_v24 = vpop.eup %2075  ;;  %v1220_v29 = vadd.f32 1.0, %v2074_v46  ;;  %v2970_v50 = vadd.f32 %v3562_v3, %v2596_v38  ;;  %v923_v38 = vmul.f32 %v859_v25, %v2931_v34 }
 0x12f   : > { %2083 = vtanh.f32 %v1101_v53  ;;  %v2078_v56 = vpop.eup %2077  ;;  %v3563_v53 = vld [vmem:[#allocation24_spill] sm:$0xff]  ;;  %v925_v46 = vmul.f32 %v861_v60, %v2935_v40  ;;  %v991_v3 = vmul.f32 0.044715, %v927_v7  ;;  %v851_v7 = vmul.f32 %v2953_v26, %v2953_v26 }
 0x130   : > { %2085 = vtanh.f32 %v1110_v15  ;;  %v2080_v14 = vpop.eup %2079  ;;  %v2974_v61 = vadd.f32 %v3563_v53, %v2558_v21  ;;  %v855_v15 = vmul.f32 %v2957_v36, %v2957_v36  ;;  %v1284_v4 = vmul.f32 0.5, %v1220_v29 }
 0x131   : > { %v2959_v10 = vpop.f32.mrf.mxu0  ;;  %2087 = vtanh.f32 %v1106_v6  ;;  %v1244_v6 = vadd.f32 1.0, %v2076_v24  ;;  %v1242_v9 = vadd.f32 1.0, %v2078_v56  ;;  %v1057_v29 = vadd.f32 %v993_v63, %v2903_v62 }
 0x132   : > { %3561 = vst [vmem:[#allocation17_spill] sm:$0xff] %v2959_v10  ;;  %2089 = vtanh.f32 %v1108_v16  ;;  %v1310_v16 = vmul.f32 0.5, %v1246_v27  ;;  %v2989_v48 = vmul.f32 %v1284_v4, %v2745_v23  ;;  %v857_v58 = vmul.f32 %v2974_v61, %v2974_v61  ;;  %v3008_v23 = vpop.f32.mrf.mxu3 }
 0x133   : > { %v1240_v18 = vadd.f32 1.0, %v2080_v14  ;;  %v853_v19 = vmul.f32 %v2970_v50, %v2970_v50  ;;  %v1308_v56 = vmul.f32 0.5, %v1244_v6  ;;  %v919_v4 = vmul.f32 %v855_v15, %v2957_v36 }
 0x134   : > { %v2082_v13 = vpop.eup %2081  ;;  %v987_v8 = vmul.f32 0.044715, %v923_v38  ;;  %v989_v63 = vmul.f32 0.044715, %v925_v46  ;;  %v1055_v14 = vadd.f32 %v991_v3, %v2913_v45  ;;  %v1306_v44 = vmul.f32 0.5, %v1242_v9 }
 0x135   : > { %v1248_v21 = vadd.f32 1.0, %v2082_v13  ;;  %v2985_v53 = vpop.eup %2083  ;;  %v921_v55 = vmul.f32 %v857_v58, %v2974_v61  ;;  %v1304_v6 = vmul.f32 0.5, %v1240_v18  ;;  %2091 = vtanh.f32 %v2943_v39 }
 0x136   : > { %v2086_v24 = vpop.eup %2085  ;;  %v1372_v15 = vmul.f32 %v1308_v56, %v2809_v20  ;;  %2093 = vtanh.f32 %v2790_v57  ;;  %v977_v46 = vmul.f32 0.044715, %v913_v12  ;;  %v1051_v9 = vadd.f32 %v987_v8, %v2931_v34 }
 0x137   : > { %v1312_v25 = vmul.f32 0.5, %v1248_v21  ;;  %v2088_v60 = vpop.eup %2087  ;;  %v1374_v21 = vmul.f32 %v1310_v16, %v2845_v0  ;;  %v1238_v51 = vadd.f32 1.0, %v2086_v24  ;;  %v975_v0 = vmul.f32 0.044715, %v2946_v2  ;;  %v3015_v16 = vpop.f32.mrf.mxu1 }
 0x138   : > { %v2090_v13 = vpop.eup %2089  ;;  %v1053_v3 = vadd.f32 %v989_v63, %v2935_v40  ;;  %v1370_v39 = vmul.f32 %v1306_v44, %v2812_v49  ;;  %v915_v20 = vmul.f32 %v851_v7, %v2953_v26  ;;  %v917_v58 = vmul.f32 %v853_v19, %v2970_v50 }
 0x139   : > { %v2998_v27 = vpop.f32.mrf.mxu0  ;;  %v1376_v10 = vmul.f32 %v1312_v25, %v2884_v42  ;;  %v1236_v38 = vadd.f32 1.0, %v2090_v13  ;;  %v1119_v42 = vmul.f32 0.7978846, %v1055_v14  ;;  %v1302_v24 = vmul.f32 0.5, %v1238_v51 }
 0x13a   : > { %3565 = vst [vmem:[#allocation19_spill] sm:$0xff] %v2998_v27  ;;  %v1121_v27 = vmul.f32 0.7978846, %v1057_v29  ;;  %v983_v57 = vmul.f32 0.044715, %v919_v4  ;;  %v1430_v8 = vpack.c.bf16 %v1372_v15, %v1370_v39  ;;  %v1368_v29 = vmul.f32 %v1304_v6, %v2819_v59  ;;  %v3566_v15 = vld [vmem:[#allocation28_spill] sm:$0xff] }
 0x13b   : > { %v1432_v32 = vpack.c.bf16 %v1376_v10, %v1374_v21  ;;  %v1234_v10 = vadd.f32 1.0, %v2088_v60  ;;  %v985_v2 = vmul.f32 0.044715, %v921_v55  ;;  %v1300_v25 = vmul.f32 0.5, %v1236_v38  ;;  %v2092_v18 = vpop.eup %2091 }
 0x13c   : > { %2095 = vtanh.f32 %v1121_v27  ;;  %v1041_v49 = vadd.f32 %v977_v46, %v2927_v5  ;;  %v1115_v51 = vmul.f32 0.7978846, %v1051_v9  ;;  %v2094_v44 = vpop.eup %2093  ;;  %v1117_v60 = vmul.f32 0.7978846, %v1053_v3  ;;  %v3567_v46 = vld [vmem:[#allocation11_spill] sm:$0xff] }
 0x13d   : > { %1538 = vmatpush.bf16.msrb.mxu2 %v1432_v32  ;;  %v1039_v32 = vadd.f32 %v975_v0, %v2900_v54  ;;  %2097 = vtanh.f32 %v1119_v42  ;;  %v1366_v7 = vmul.f32 %v1302_v24, %v2829_v47  ;;  %v1298_v19 = vmul.f32 0.5, %v1234_v10  ;;  %v3035_v42 = vpop.f32.mrf.mxu3 }
 0x13e   : > { %v1219_v55 = vadd.f32 1.0, %v2092_v18  ;;  %v979_v27 = vmul.f32 0.044715, %v915_v20  ;;  %v981_v56 = vmul.f32 0.044715, %v917_v58  ;;  %v1047_v13 = vadd.f32 %v983_v57, %v2957_v36 }
 0x13f   : > { %v1221_v59 = vadd.f32 1.0, %v2094_v44  ;;  %v1049_v4 = vadd.f32 %v985_v2, %v2974_v61  ;;  %v1428_v63 = vpack.c.bf16 %v1368_v29, %v1366_v7  ;;  %v1364_v14 = vmul.f32 %v1300_v25, %v2840_v17  ;;  %v3043_v2 = vpop.f32.mrf.mxu1  ;;  %v3569_v25 = vld [vmem:[#allocation22_spill] sm:$0xff] }
 0x140   : > { %v1283_v21 = vmul.f32 0.5, %v1219_v55  ;;  %v1031_v38 = vadd.f32 %v3566_v15, %v2764_v35  ;;  %v1103_v0 = vmul.f32 0.7978846, %v1039_v32  ;;  %v3033_v47 = vadd.f32 %v2868_v11, %v3567_v46 }
 0x141   : > { %v3020_v12 = vpop.f32.mrf.mxu0  ;;  %1539 = vmatpush.bf16.msrb.mxu2 %v1430_v8  ;;  %2099 = vtanh.f32 %v1115_v51  ;;  %v1105_v9 = vmul.f32 0.7978846, %v1041_v49  ;;  %v1362_v3 = vmul.f32 %v1298_v19, %v2825_v43  ;;  %v1285_v39 = vmul.f32 0.5, %v1221_v59 }
 0x142   : > { %v2096_v6 = vpop.eup %2095  ;;  %3568 = vst [vmem:[#allocation24_spill] sm:$0xff] %v3033_v47  ;;  %2101 = vtanh.f32 %v1117_v60  ;;  %v1043_v24 = vadd.f32 %v979_v27, %v2953_v26  ;;  %v1045_v10 = vadd.f32 %v981_v56, %v2970_v50  ;;  %v1111_v20 = vmul.f32 0.7978846, %v1047_v13 }
 0x143   : > { %v2098_v17 = vpop.eup %2097  ;;  %v3041_v58 = vmul.f32 %v1283_v21, %v2795_v22  ;;  %v1113_v11 = vmul.f32 0.7978846, %v1049_v4  ;;  %v1249_v57 = vadd.f32 1.0, %v2096_v6  ;;  %v1426_v29 = vpack.c.bf16 %v1364_v14, %v1362_v3  ;;  %v3571_v14 = vld [vmem:[#allocation10_spill] sm:$0xff]  ;;  %v3572_v3 = vld [vmem:[#allocation21_spill] sm:$0xff] }
 0x144   : > { %v3048_v18 = vmul.f32 %v1285_v39, %v3569_v25  ;;  %v1095_v43 = vmul.f32 0.7978846, %v1031_v38  ;;  %2103 = vtanh.f32 %v1103_v0  ;;  %v1097_v32 = vmul.f32 0.7978846, %v2941_v31  ;;  %v3573_v39 = vld [vmem:[#allocation23_spill] sm:$0xff]  ;;  %v3575_v25 = vld [vmem:[#allocation9_spill] sm:$0xff] }
 0x145   : > { %1540 = vmatpush.bf16.msrb.mxu2 %v1428_v63  ;;  %2105 = vtanh.f32 %v1105_v9  ;;  %v1247_v49 = vadd.f32 1.0, %v2098_v17  ;;  %v1107_v44 = vmul.f32 0.7978846, %v1043_v24  ;;  %v883_v60 = vmul.f32 %v3033_v47, %v3033_v47  ;;  %v3063_v6 = vpop.f32.mrf.mxu3 }
 0x146   : > { %2107 = vtanh.f32 %v1111_v20  ;;  %v1109_v19 = vmul.f32 0.7978846, %v1045_v10  ;;  %v1313_v55 = vmul.f32 0.5, %v1249_v57  ;;  %v3570_v31 = vpack.c.bf16 %v2861_v37, %v2872_v30 }
 0x147   : > { %v2100_v51 = vpop.eup %2099  ;;  %2109 = vtanh.f32 %v1113_v11  ;;  %v1311_v27 = vmul.f32 0.5, %v1247_v49  ;;  %v947_v13 = vmul.f32 %v883_v60, %v3033_v47  ;;  %v3061_v21 = vadd.f32 %v2966_v52, %v3571_v14  ;;  %v3069_v9 = vpop.f32.mrf.mxu1  ;;  %v1905_v52 = vld [vmem:[%s3505_s3] sm:$0xf] }
 0x148   : > { %v2102_v7 = vpop.eup %2101  ;;  %2111 = vtanh.f32 %v1095_v43  ;;  %v1243_v59 = vadd.f32 1.0, %v2100_v51  ;;  %v1377_v15 = vmul.f32 %v1313_v55, %v2903_v62  ;;  %v3574_v17 = vpack.c.bf16 %v3572_v3, %v3573_v39  ;;  %v1966_v62 = vld [vmem:[%s3505_s3 + $0x4] sm:$0xf0] }
 0x149   : > { %v3045_v8 = vpop.f32.mrf.mxu0  ;;  %1541 = vmatpush.bf16.msrb.mxu2 %v1426_v29  ;;  %2113 = vtanh.f32 %v1097_v32  ;;  %v1245_v4 = vadd.f32 1.0, %v2102_v7  ;;  %v1375_v0 = vmul.f32 %v1311_v27, %v2913_v45  ;;  %v1011_v10 = vmul.f32 0.044715, %v947_v13 }
 0x14a   : > { %v2104_v56 = vpop.eup %2103  ;;  %2115 = vtanh.f32 %v1107_v44  ;;  %v1307_v20 = vmul.f32 0.5, %v1243_v59  ;;  %v887_v29 = vmul.f32 %v3061_v21, %v3061_v21  ;;  %v3084_v43 = vadd.f32 %v3008_v23, %v3575_v25 }
 0x14b   : > { %v2106_v63 = vpop.eup %2105  ;;  %2117 = vtanh.f32 %v1109_v19  ;;  %v1309_v11 = vmul.f32 0.5, %v1245_v4  ;;  %v1231_v57 = vadd.f32 1.0, %v2104_v56  ;;  %v1433_v32 = vpack.c.bf16 %v1377_v15, %v1375_v0 }
 0x14c   : > { %v2108_v37 = vpop.eup %2107  ;;  %3576 = vst [vmem:[#allocation28_spill] sm:$0xff] %v3084_v43  ;;  %v1233_v49 = vadd.f32 1.0, %v2106_v63  ;;  %v3086_v44 = vor.u32 %v1966_v62, %v1905_v52  ;;  %v3577_v27 = vpack.c.bf16 %v2848_v41, %v2836_v33  ;;  %v1227_v56 = vadd.f32 1.0, %v2920_v28 }
 0x14d   : > { %1542 = vmatpush.bf16.msrb.mxu2 %v3570_v31  ;;  %v2110_v30 = vpop.eup %2109  ;;  %v1239_v60 = vadd.f32 1.0, %v2108_v37  ;;  %v1295_v19 = vmul.f32 0.5, %v1231_v57  ;;  %v1229_v13 = vadd.f32 1.0, %v2985_v53  ;;  %v1371_v59 = vmul.f32 %v1307_v20, %v2931_v34  ;;  %v829_v39 = vpop.f32.mrf.mxu3  ;;  %v3582_v57 = vld [vmem:[#allocation29_spill] sm:$0xff] }
 0x14e   : > { %v2112_v24 = vpop.eup %2111  ;;  %v1241_v7 = vadd.f32 1.0, %v2110_v30  ;;  %v1297_v31 = vmul.f32 0.5, %v1233_v49  ;;  %v1373_v4 = vmul.f32 %v1309_v11, %v2935_v40  ;;  %v1291_v33 = vmul.f32 0.5, %v1227_v56  ;;  %v3579_v40 = vld [vmem:[#allocation25_spill] sm:$0xff]  ;;  %v3114_v11 = vpop.permute.xlu0 %424 }
 0x14f   : > { %v2114_v45 = vpop.eup %2113  ;;  %v1223_v23 = vadd.f32 1.0, %v2112_v24  ;;  %v3096_v63 = vmul.f32 %v1295_v19, %v2900_v54  ;;  %v1293_v41 = vmul.f32 0.5, %v1229_v13  ;;  %v1303_v0 = vmul.f32 0.5, %v1239_v60  ;;  %v3123_v25 = vpop.f32.mrf.mxu1  ;;  %v3583_v60 = vld [vmem:[#allocation26_spill] sm:$0xff] }
 0x150   : > { %v2116_v51 = vpop.eup %2115  ;;  %v1225_v14 = vadd.f32 1.0, %v2114_v45  ;;  %v3099_v37 = vmul.f32 %v1297_v31, %v2927_v5  ;;  %v1305_v28 = vmul.f32 0.5, %v1241_v7  ;;  %v3578_v34 = vpack.c.bf16 %v2989_v48, %v2981_v1  ;;  %v3580_v5 = vld [vmem:[#allocation27_spill] sm:$0xff]  ;;  %v3581_v1 = vld [vmem:[#allocation12_spill] sm:$0xff] }
 0x151   : > { %v3066_v38 = vpop.f32.mrf.mxu0  ;;  %1543 = vmatpush.bf16.msrb.mxu2 %v3574_v17  ;;  %v2118_v55 = vpop.eup %2117  ;;  %v1287_v30 = vmul.f32 0.5, %v1223_v23  ;;  %v1235_v3 = vadd.f32 1.0, %v2116_v51  ;;  %v3107_v17 = vmul.f32 %v1291_v33, %v3579_v40  ;;  %v3110_v52 = vmul.f32 %v1293_v41, %v3580_v5  ;;  %v3585_v23 = vld [vmem:[#allocation8_spill] sm:$0xff]  ;;  %v3589_v40 = vld [vmem:[#allocation5_spill] sm:$0xff] }
 0x152   : > { %v1237_v53 = vadd.f32 1.0, %v2118_v55  ;;  %v1425_v54 = vpack.c.bf16 %v3099_v37, %v3096_v63  ;;  %v1289_v62 = vmul.f32 0.5, %v1225_v14  ;;  %v1075_v24 = vadd.f32 %v1011_v10, %v3033_v47  ;;  %v3584_v55 = vld [vmem:[#allocation6_spill] sm:$0xff] }
 0x153   : > { %v951_v20 = vmul.f32 %v887_v29, %v3061_v21  ;;  %v3117_v48 = vmul.f32 %v1287_v30, %v2764_v35  ;;  %v3121_v45 = vadd.f32 %v3582_v57, %v3581_v1  ;;  %v1431_v49 = vpack.c.bf16 %v1373_v4, %v1371_v59  ;;  %v3586_v4 = vld [vmem:[#allocation14_spill] sm:$0xff] }
 0x154   : > { %v3128_v10 = vmul.f32 %v1289_v62, %v3583_v60  ;;  %v1367_v29 = vmul.f32 %v1303_v0, %v2957_v36  ;;  %v1369_v35 = vmul.f32 %v1305_v28, %v2974_v61  ;;  %v1301_v7 = vmul.f32 0.5, %v1237_v53  ;;  %v3587_v28 = vld [vmem:[#allocation13_spill] sm:$0xff]  ;;  %v3588_v53 = vld [vmem:[#allocation16_spill] sm:$0xff] }
 0x155   : > { %1544 = vmatpush.bf16.msrb.mxu2 %v3577_v27  ;;  %v889_v19 = vmul.f32 %v3084_v43, %v3084_v43  ;;  %v3137_v27 = vadd.f32 %v3035_v42, %v3584_v55  ;;  %v1015_v56 = vmul.f32 0.044715, %v951_v20  ;;  %v1139_v13 = vmul.f32 0.7978846, %v1075_v24  ;;  %v831_v5 = vpop.f32.mrf.mxu3 }
 0x156   : > { %v885_v36 = vmul.f32 %v3121_v45, %v3121_v45  ;;  %v3145_v61 = vadd.f32 %v3063_v6, %v3585_v23  ;;  %v1429_v33 = vpack.c.bf16 %v1369_v35, %v1367_v29  ;;  %v1365_v41 = vmul.f32 %v1301_v7, %v2970_v50  ;;  %v1913_v35 = vld [vmem:[%s3505_s3 + $0x10] sm:$0xf] }
 0x157   : > { %v953_v30 = vmul.f32 %v889_v19, %v3084_v43  ;;  %v891_v0 = vmul.f32 %v3137_v27, %v3137_v27  ;;  %v1079_v6 = vadd.f32 %v1015_v56, %v3061_v21  ;;  %v3166_v50 = vadd.f32 %v829_v39, %v3589_v40  ;;  %v3180_v39 = vpop.f32.mrf.mxu1  ;;  %v3591_v19 = vld [vmem:[#allocation7_spill] sm:$0xff]  ;;  %v3193_v56 = vpop.permute.xlu1 %414 }
 0x158   : > { %2119 = vtanh.f32 %v1139_v13  ;;  %v3169_v62 = vmul.f32 %v885_v36, %v3121_v45  ;;  %v3191_v55 = vadd.f32 %v831_v5, %v3591_v19  ;;  %v3592_v13 = vld [vmem:[#allocation15_spill] sm:$0xff] }
 0x159   : > { %v720_v15 = vpop.f32.mrf.mxu0  ;;  %1545 = vmatpush.bf16.msrb.mxu2 %v3578_v34  ;;  %v3161_v34 = vadd.f32 %v3066_v38, %v3588_v53  ;;  %v1017_v38 = vmul.f32 0.044715, %v953_v30  ;;  %v955_v57 = vmul.f32 %v891_v0, %v3137_v27  ;;  %v1143_v7 = vmul.f32 0.7978846, %v1079_v6  ;;  %v3594_v30 = vld [vmem:[#allocation18_spill] sm:$0xff]  ;;  %v3595_v0 = vld [vmem:[#allocation19_spill] sm:$0xff] }
 0x15a   : > { %v3197_v36 = vadd.f32 %v3045_v8, %v3592_v13  ;;  %v3210_v6 = vadd.f32 %v3595_v0, %v3594_v30  ;;  %v3214_v8 = vadd.f32 %v3020_v12, %v3114_v11  ;;  %v897_v12 = vmul.f32 %v3191_v55, %v3191_v55 }
 0x15b   : > { %v876_v23 = vmul.f32 %v3161_v34, %v3161_v34  ;;  %v1019_v19 = vmul.f32 0.044715, %v955_v57  ;;  %2121 = vtanh.f32 %v1143_v7 }
 0x15c   : > { %1546 = vmatmul.bf16.vlgmr.msrb.gmra.mxu2 %v3086_v44 }
 0x15d   : > { %1596 = vmatpush.bf16.msra.mxu2 %v1433_v32  ;;  %v1299_v32 = vmul.f32 0.5, %v1235_v3  ;;  %v3156_v3 = vadd.f32 %v720_v15, %v3587_v28  ;;  %v3171_v15 = vpop.permute.xlu0 %409  ;;  %v1083_v37 = vadd.f32 %v1019_v19, %v3137_v27 }
 0x15e   : > { %v3226_v22 = vpop.eup %2119 }
 0x15f   : > { %v1363_v42 = vmul.f32 %v1299_v32, %v2953_v26  ;;  %v893_v26 = vmul.f32 %v3145_v61, %v3145_v61  ;;  %v878_v29 = vmul.f32 %v3156_v3, %v3156_v3  ;;  %v1968_v32 = vld [vmem:[%s3505_s3 + $0x14] sm:$0xf0] }
 0x161   : > { %1597 = vmatpush.bf16.msra.mxu2 %v1431_v49  ;;  %v722_v59 = vpop.f32.mrf.mxu0  ;;  %v1427_v20 = vpack.c.bf16 %v1365_v41, %v1363_v42  ;;  %v3590_v49 = vld [vmem:[#allocation30_spill] sm:$0xff]  ;;  %v3593_v42 = vld [vmem:[#allocation17_spill] sm:$0xff]  ;;  %v942_v0 = vmul.f32 %v878_v29, %v3156_v3 }
 0x162   : > { %v3148_v14 = vadd.f32 %v722_v59, %v3586_v4  ;;  %v3178_v60 = vadd.f32 %v3590_v49, %v3171_v15  ;;  %v957_v59 = vmul.f32 %v893_v26, %v3145_v61  ;;  %v3206_v41 = vadd.f32 %v3593_v42, %v3193_v56 }
 0x163   : > { %v1081_v49 = vadd.f32 %v1017_v38, %v3084_v43  ;;  %v3597_v43 = vpack.c.bf16 %v3110_v52, %v3107_v17 }
 0x164   : > { %v880_v24 = vmul.f32 %v3148_v14, %v3148_v14  ;;  %v866_v42 = vmul.f32 %v3178_v60, %v3178_v60  ;;  %v1021_v38 = vmul.f32 0.044715, %v957_v59  ;;  %v868_v29 = vmul.f32 %v3206_v41, %v3206_v41 }
 0x165   : > { %1598 = vmatpush.bf16.msra.mxu2 %v1429_v33  ;;  %v895_v33 = vmul.f32 %v3166_v50, %v3166_v50  ;;  %v1145_v63 = vmul.f32 0.7978846, %v1081_v49  ;;  %v1006_v59 = vmul.f32 0.044715, %v942_v0 }
 0x166   : > { %v944_v5 = vmul.f32 %v880_v24, %v3148_v14  ;;  %v874_v24 = vmul.f32 %v3197_v36, %v3197_v36  ;;  %v932_v49 = vmul.f32 %v868_v29, %v3206_v41 }
 0x167   : > { %v959_v57 = vmul.f32 %v895_v33, %v3166_v50  ;;  %v961_v33 = vmul.f32 %v897_v12, %v3191_v55  ;;  %2123 = vtanh.f32 %v1145_v63  ;;  %v1070_v52 = vadd.f32 %v1006_v59, %v3156_v3 }
 0x168   : > { %v938_v51 = vmul.f32 %v874_v24, %v3197_v36 }
 0x169   : > { %1599 = vmatpush.bf16.msra.mxu2 %v1427_v20  ;;  %v725_v40 = vpop.f32.mrf.mxu0  ;;  %v3220_v20 = vor.u32 %v1968_v32, %v1913_v35  ;;  %v870_v32 = vmul.f32 %v3210_v6, %v3210_v6  ;;  %v1025_v63 = vmul.f32 0.044715, %v961_v33 }
 0x16a   : > { %v3218_v26 = vadd.f32 %v725_v40, %v3567_v46  ;;  %v940_v46 = vmul.f32 %v876_v23, %v3161_v34  ;;  %v872_v23 = vmul.f32 %v3214_v8, %v3214_v8  ;;  %v1008_v40 = vmul.f32 0.044715, %v944_v5 }
 0x16b   : > { %3596 = vst [vmem:[#allocation11_spill] sm:$0xff] %v3220_v20  ;;  %v1085_v5 = vadd.f32 %v1021_v38, %v3145_v61  ;;  %v934_v19 = vmul.f32 %v870_v32, %v3210_v6  ;;  %v1002_v38 = vmul.f32 0.044715, %v938_v51  ;;  %v3598_v32 = vpack.c.bf16 %v3128_v10, %v3117_v48  ;;  %v1970_v48 = vld [vmem:[%s3505_s3 + $0x24] sm:$0xf0] }
 0x16c   : > { %v882_v35 = vmul.f32 %v3218_v26, %v3218_v26  ;;  %1551 = vmatmul.bf16.gmra.mxu2 %v3220_v20  ;;  %v1004_v47 = vmul.f32 0.044715, %v940_v46  ;;  %v3257_v20 = vpop.f32.mrf.mxu1  ;;  %v936_v0 = vmul.f32 %v872_v23, %v3214_v8  ;;  %v1072_v12 = vadd.f32 %v1008_v40, %v3148_v14  ;;  %v3266_v46 = vpop.eup %2121 }
 0x16d   : > { %1600 = vmatpush.bf16.msra.mxu2 %v1425_v54  ;;  %v930_v54 = vmul.f32 %v866_v42, %v3178_v60  ;;  %v1134_v10 = vmul.f32 0.7978846, %v1070_v52  ;;  %v1066_v33 = vadd.f32 %v1002_v38, %v3197_v36  ;;  %v1089_v52 = vadd.f32 %v1025_v63, %v3191_v55 }
 0x16e   : > { %v946_v31 = vmul.f32 %v882_v35, %v3218_v26  ;;  %v1023_v35 = vmul.f32 0.044715, %v959_v57  ;;  %v1068_v57 = vadd.f32 %v1004_v47, %v3161_v34  ;;  %v1000_v59 = vmul.f32 0.044715, %v936_v0 }
 0x16f   : > { %v994_v17 = vmul.f32 0.044715, %v930_v54  ;;  %v998_v54 = vmul.f32 0.044715, %v934_v19  ;;  %v1136_v51 = vmul.f32 0.7978846, %v1072_v12  ;;  %v3287_v19 = vpop.eup %2123 }
 0x170   : > { %v1010_v7 = vmul.f32 0.044715, %v946_v31  ;;  %v1087_v40 = vadd.f32 %v1023_v35, %v3166_v50  ;;  %v3599_v35 = vpack.c.bf16 %v3048_v18, %v3041_v58  ;;  %v1013_v0 = vmul.f32 0.044715, %v3169_v62 }
 0x171   : > { %1601 = vmatpush.bf16.msra.mxu2 %v3597_v43  ;;  %v727_v42 = vpop.f32.mrf.mxu0  ;;  %v1147_v43 = vmul.f32 0.7978846, %v1083_v37  ;;  %v996_v37 = vmul.f32 0.044715, %v932_v49  ;;  %v1058_v47 = vadd.f32 %v994_v17, %v3178_v60  ;;  %v1132_v49 = vmul.f32 0.7978846, %v1068_v57 }
 0x172   : > { %v1074_v31 = vadd.f32 %v1010_v7, %v3218_v26  ;;  %v3263_v24 = vadd.f32 %v727_v42, %v3581_v1  ;;  %v1149_v1 = vmul.f32 0.7978846, %v1085_v5  ;;  %v1921_v42 = vld [vmem:[%s3505_s3 + $0x20] sm:$0xf]  ;;  %v1151_v12 = vmul.f32 0.7978846, %v1087_v40 }
 0x173   : > { %2125 = vtanh.f32 %v1147_v43  ;;  %v3292_v17 = vor.u32 %v1970_v48, %v1921_v42  ;;  %v1060_v58 = vadd.f32 %v996_v37, %v3206_v41  ;;  %v1122_v38 = vmul.f32 0.7978846, %v1058_v47 }
 0x174   : > { %v884_v29 = vmul.f32 %v3263_v24, %v3263_v24  ;;  %v1138_v23 = vmul.f32 0.7978846, %v1074_v31  ;;  %v1064_v31 = vadd.f32 %v1000_v59, %v3214_v8  ;;  %v811_v18 = vpop.f32.mrf.mxu1  ;;  %v1062_v57 = vadd.f32 %v998_v54, %v3210_v6 }
 0x175   : > { %1602 = vmatpush.bf16.msra.mxu2 %v3598_v32  ;;  %3600 = vst [vmem:[#allocation22_spill] sm:$0xff] %v3292_v17  ;;  %v1130_v62 = vmul.f32 0.7978846, %v1066_v33  ;;  %v1077_v37 = vadd.f32 %v1013_v0, %v3121_v45  ;;  %v1153_v54 = vmul.f32 0.7978846, %v1089_v52  ;;  %v3316_v33 = vadd.f32 %v3180_v39, %v3588_v53 }
 0x176   : > { %v948_v7 = vmul.f32 %v884_v29, %v3263_v24  ;;  %2127 = vtanh.f32 %v1138_v23  ;;  %v1128_v40 = vmul.f32 0.7978846, %v1064_v31  ;;  %v1124_v59 = vmul.f32 0.7978846, %v1060_v58 }
 0x177   : > { %2129 = vtanh.f32 %v1149_v1  ;;  %v3300_v1 = vadd.f32 %v811_v18, %v3586_v4  ;;  %v1126_v47 = vmul.f32 0.7978846, %v1062_v57 }
 0x178   : > { %v1012_v5 = vmul.f32 0.044715, %v948_v7  ;;  %2131 = vtanh.f32 %v1136_v51  ;;  %v3308_v51 = vadd.f32 %v3257_v20, %v3587_v28  ;;  %v3320_v20 = vmul.f32 0.7978846, %v1077_v37 }
 0x179   : > { %1603 = vmatpush.bf16.msra.mxu2 %v3599_v35  ;;  %2133 = vtanh.f32 %v1134_v10  ;;  %v3297_v32 = vpop.eup %2125  ;;  %v3312_v10 = vadd.f32 %v3015_v16, %v3193_v56  ;;  %v3324_v35 = vadd.f32 %v3069_v9, %v3114_v11  ;;  %v3328_v16 = vadd.f32 %v3123_v25, %v3592_v13 }
 0x17a   : > { %v1076_v43 = vadd.f32 %v1012_v5, %v3263_v24  ;;  %2135 = vtanh.f32 %v1132_v49  ;;  %v881_v5 = vmul.f32 %v3300_v1, %v3300_v1  ;;  %v879_v53 = vmul.f32 %v3308_v51, %v3308_v51 }
 0x17b   : > { %2137 = vtanh.f32 %v1122_v38  ;;  %v869_v58 = vmul.f32 %v3312_v10, %v3312_v10  ;;  %v3340_v25 = vadd.f32 %v3043_v2, %v3594_v30  ;;  %v877_v13 = vmul.f32 %v3316_v33, %v3316_v33 }
 0x17c   : > { %v1140_v29 = vmul.f32 0.7978846, %v1076_v43  ;;  %v2128_v23 = vpop.eup %2127  ;;  %1556 = vmatmul.bf16.gmra.mxu2 %v3292_v17  ;;  %v945_v18 = vmul.f32 %v881_v5, %v3300_v1  ;;  %v873_v57 = vmul.f32 %v3324_v35, %v3324_v35  ;;  %v943_v37 = vmul.f32 %v879_v53, %v3308_v51 }
 0x17d   : > { %v3303_v63 = vpop.eup %2129  ;;  %v1266_v42 = vadd.f32 1.0, %v2128_v23 }
 0x17e   : > { %2139 = vtanh.f32 %v1140_v29  ;;  %v2132_v7 = vpop.eup %2131  ;;  %v1972_v29 = vld [vmem:[%s3505_s3 + $0x34] sm:$0xf0] }
 0x17f   : > { %2141 = vtanh.f32 %v1151_v12  ;;  %v2134_v4 = vpop.eup %2133  ;;  %v1264_v49 = vadd.f32 1.0, %v2132_v7  ;;  %v3601_v12 = vld [vmem:[#allocation20_spill] sm:$0xff]  ;;  %v1330_v52 = vmul.f32 0.5, %v1266_v42 }
 0x180   : > { %2143 = vtanh.f32 %v1130_v62  ;;  %v2136_v48 = vpop.eup %2135  ;;  %v3334_v31 = vadd.f32 %v3601_v12, %v3171_v15  ;;  %v1262_v9 = vadd.f32 1.0, %v2134_v4  ;;  %v1929_v15 = vld [vmem:[%s3505_s3 + $0x30] sm:$0xf] }
 0x181   : > { %2145 = vtanh.f32 %v1124_v59  ;;  %v2138_v28 = vpop.eup %2137  ;;  %v1328_v2 = vmul.f32 0.5, %v1264_v49  ;;  %v1260_v30 = vadd.f32 1.0, %v2136_v48  ;;  %v1009_v49 = vmul.f32 0.044715, %v945_v18 }
 0x182   : > { %2147 = vtanh.f32 %v1128_v40  ;;  %v1250_v39 = vadd.f32 1.0, %v2138_v28  ;;  %v875_v40 = vmul.f32 %v3328_v16, %v3328_v16  ;;  %v1326_v42 = vmul.f32 0.5, %v1262_v9 }
 0x183   : > { %2149 = vtanh.f32 %v1153_v54  ;;  %v3359_v48 = vor.u32 %v1972_v29, %v1929_v15  ;;  %v1392_v17 = vmul.f32 %v1328_v2, %v3148_v14  ;;  %v1324_v53 = vmul.f32 0.5, %v1260_v30 }
 0x184   : > { %v2140_v0 = vpop.eup %2139  ;;  %2151 = vtanh.f32 %v1126_v47  ;;  %v1314_v59 = vmul.f32 0.5, %v1250_v39  ;;  %v1394_v47 = vmul.f32 %v1330_v52, %v3218_v26  ;;  %v871_v39 = vmul.f32 %v3340_v25, %v3340_v25 }
 0x185   : > { %v2142_v56 = vpop.eup %2141  ;;  %v1268_v43 = vadd.f32 1.0, %v2140_v0  ;;  %v941_v0 = vmul.f32 %v877_v13, %v3316_v33  ;;  %v939_v26 = vmul.f32 %v875_v40, %v3328_v16  ;;  %v1007_v9 = vmul.f32 0.044715, %v943_v37 }
 0x186   : > { %v2144_v11 = vpop.eup %2143  ;;  %v937_v14 = vmul.f32 %v873_v57, %v3324_v35  ;;  %v1073_v29 = vadd.f32 %v1009_v49, %v3300_v1  ;;  %v933_v40 = vmul.f32 %v869_v58, %v3312_v10  ;;  %v935_v57 = vmul.f32 %v871_v39, %v3340_v25 }
 0x187   : > { %v2146_v38 = vpop.eup %2145  ;;  %v1332_v62 = vmul.f32 0.5, %v1268_v43  ;;  %v1258_v5 = vadd.f32 1.0, %v2144_v11  ;;  %v1390_v11 = vmul.f32 %v1326_v42, %v3156_v3  ;;  %v1005_v15 = vmul.f32 0.044715, %v941_v0 }
 0x188   : > { %v2148_v23 = vpop.eup %2147  ;;  %v1252_v54 = vadd.f32 1.0, %v2146_v38  ;;  %v867_v3 = vmul.f32 %v3334_v31, %v3334_v31  ;;  %v1003_v37 = vmul.f32 0.044715, %v939_v26  ;;  %2153 = vtanh.f32 %v3320_v20 }
 0x189   : > { %v2150_v7 = vpop.eup %2149  ;;  %v1396_v4 = vmul.f32 %v1332_v62, %v3263_v24  ;;  %v1256_v38 = vadd.f32 1.0, %v2148_v23  ;;  %v3366_v24 = vmul.f32 %v1314_v59, %v3178_v60  ;;  %v1322_v13 = vmul.f32 0.5, %v1258_v5 }
 0x18a   : > { %v2152_v28 = vpop.eup %2151  ;;  %v1316_v12 = vmul.f32 0.5, %v1252_v54  ;;  %v1279_v62 = vadd.f32 1.0, %v2142_v56  ;;  %v1440_v2 = vpack.c.bf16 %v1392_v17, %v1390_v11  ;;  %v1281_v23 = vadd.f32 1.0, %v2150_v7 }
 0x18b   : > { %v1442_v43 = vpack.c.bf16 %v1396_v4, %v1394_v47  ;;  %v1254_v18 = vadd.f32 1.0, %v2152_v28  ;;  %v1320_v30 = vmul.f32 0.5, %v1256_v38  ;;  %v1071_v54 = vadd.f32 %v1007_v9, %v3308_v51 }
 0x18c   : > { %v3369_v52 = vmul.f32 %v1316_v12, %v3206_v41  ;;  %1561 = vmatmul.bf16.gmra.mxu2 %v3359_v48  ;;  %v1388_v41 = vmul.f32 %v1324_v53, %v3161_v34  ;;  %v1386_v59 = vmul.f32 %v1322_v13, %v3197_v36  ;;  %v1001_v17 = vmul.f32 0.044715, %v937_v14 }
 0x18d   : > { %1570 = vmatpush.bf16.msrb.mxu3 %v1442_v43  ;;  %v1318_v47 = vmul.f32 0.5, %v1254_v18  ;;  %v1069_v34 = vadd.f32 %v1005_v15, %v3316_v33  ;;  %v1137_v56 = vmul.f32 0.7978846, %v1073_v29  ;;  %v1384_v7 = vmul.f32 %v1320_v30, %v3214_v8  ;;  %v1907_v15 = vld [vmem:[%s3505_s3 + $0x8] sm:$0xf0] }
 0x18e   : > { %v1434_v60 = vpack.c.bf16 %v3369_v52, %v3366_v24  ;;  %v1438_v4 = vpack.c.bf16 %v1388_v41, %v1386_v59  ;;  %v1275_v58 = vadd.f32 1.0, %v3297_v32  ;;  %v1277_v42 = vadd.f32 1.0, %v3303_v63  ;;  %v2154_v9 = vpop.eup %2153  ;;  %v3602_v59 = vld [vmem:[#allocation28_spill] sm:$0xff] }
 0x18f   : > { %v1343_v5 = vmul.f32 0.5, %v1279_v62  ;;  %v931_v28 = vmul.f32 %v867_v3, %v3334_v31  ;;  %v1345_v0 = vmul.f32 0.5, %v1281_v23  ;;  %v997_v49 = vmul.f32 0.044715, %v933_v40 }
 0x190   : > { %v999_v36 = vmul.f32 0.044715, %v935_v57  ;;  %v1067_v12 = vadd.f32 %v1003_v37, %v3328_v16  ;;  %v1135_v20 = vmul.f32 0.7978846, %v1071_v54  ;;  %v1382_v43 = vmul.f32 %v1318_v47, %v3210_v6 }
 0x191   : > { %1571 = vmatpush.bf16.msrb.mxu3 %v1440_v2  ;;  %v1065_v53 = vadd.f32 %v1001_v17, %v3324_v35  ;;  %v1133_v38 = vmul.f32 0.7978846, %v1069_v34  ;;  %2155 = vtanh.f32 %v1137_v56  ;;  %v1271_v8 = vadd.f32 1.0, %v3266_v46  ;;  %v1965_v46 = vld [vmem:[%s3505_s3 + $0x4] sm:$0xf] }
 0x192   : > { %v1436_v32 = vpack.c.bf16 %v1384_v7, %v1382_v43  ;;  %v1339_v63 = vmul.f32 0.5, %v1275_v58  ;;  %v1341_v39 = vmul.f32 0.5, %v1277_v42  ;;  %v1273_v26 = vadd.f32 1.0, %v3287_v19 }
 0x193   : > { %v1407_v11 = vmul.f32 %v1343_v5, %v3166_v50  ;;  %v995_v13 = vmul.f32 0.044715, %v931_v28  ;;  %v1409_v18 = vmul.f32 %v1345_v0, %v3191_v55  ;;  %v1063_v14 = vadd.f32 %v999_v36, %v3340_v25 }
 0x194   : > { %v1131_v6 = vmul.f32 0.7978846, %v1067_v12  ;;  %2157 = vtanh.f32 %v1135_v20  ;;  %v1061_v19 = vadd.f32 %v997_v49, %v3312_v10  ;;  %v1129_v29 = vmul.f32 0.7978846, %v1065_v53 }
 0x195   : > { %1572 = vmatpush.bf16.msrb.mxu3 %v1438_v4  ;;  %2159 = vtanh.f32 %v1133_v38  ;;  %v1403_v50 = vmul.f32 %v1339_v63, %v3137_v27  ;;  %v1405_v55 = vmul.f32 %v1341_v39, %v3145_v61  ;;  %v1335_v62 = vmul.f32 0.5, %v1271_v8  ;;  %v1967_v8 = vld [vmem:[%s3505_s3 + $0x14] sm:$0xf] }
 0x196   : > { %v1337_v2 = vmul.f32 0.5, %v1273_v26  ;;  %v1449_v30 = vpack.c.bf16 %v1409_v18, %v1407_v11  ;;  %v3407_v3 = vor.u32 %v1965_v46, %v1907_v15  ;;  %v1267_v23 = vadd.f32 1.0, %v3226_v22 }
 0x197   : > { %v2156_v41 = vpop.eup %2155  ;;  %v1269_v40 = vadd.f32 1.0, %v2154_v9  ;;  %v1059_v57 = vadd.f32 %v995_v13, %v3334_v31  ;;  %v1127_v37 = vmul.f32 0.7978846, %v1063_v14  ;;  %2161 = vtanh.f32 %v1131_v6  ;;  %v3604_v14 = vld [vmem:[#allocation11_spill] sm:$0xff] }
 0x198   : > { %v1125_v27 = vmul.f32 0.7978846, %v1061_v19  ;;  %2163 = vtanh.f32 %v1129_v29  ;;  %v1399_v54 = vmul.f32 %v1335_v62, %v3061_v21  ;;  %v1401_v47 = vmul.f32 %v1337_v2, %v3602_v59 }
 0x199   : > { %1573 = vmatpush.bf16.msrb.mxu3 %v1436_v32  ;;  %v1447_v17 = vpack.c.bf16 %v1405_v55, %v1403_v50  ;;  %v1331_v34 = vmul.f32 0.5, %v1267_v23  ;;  %v1333_v56 = vmul.f32 0.5, %v1269_v40  ;;  %v1265_v4 = vadd.f32 1.0, %v2156_v41  ;;  %v3605_v23 = vld [vmem:[#allocation22_spill] sm:$0xff] }
 0x19a   : > { %v2158_v61 = vpop.eup %2157  ;;  %v1123_v7 = vmul.f32 0.7978846, %v1059_v57  ;;  %2165 = vtanh.f32 %v1127_v37  ;;  %v1445_v52 = vpack.c.bf16 %v1401_v47, %v1399_v54 }
 0x19b   : > { %v2160_v22 = vpop.eup %2159  ;;  %2167 = vtanh.f32 %v1125_v27  ;;  %v1263_v24 = vadd.f32 1.0, %v2158_v61  ;;  %v1397_v21 = vmul.f32 %v1333_v56, %v3121_v45  ;;  %v1329_v42 = vmul.f32 0.5, %v1265_v4  ;;  %v1915_v45 = vld [vmem:[%s3505_s3 + $0x18] sm:$0xf0]  ;;  %v1461_v61 = vpop.permute.xlu2 %1460 }
 0x19c   : > { %1604 = vmatmul.bf16.vlgmr.msra.gmra.mxu2 %v3086_v44  ;;  %v1261_v5 = vadd.f32 1.0, %v2160_v22  ;;  %2169 = vtanh.f32 %v1123_v7  ;;  %v1918_v13 = vor.u32 %v1967_v8, %v1915_v45  ;;  %v1466_v22 = vpop.permute.xlu0 %1465 }
 0x19d   : > { %1574 = vmatpush.bf16.msrb.mxu3 %v1434_v60  ;;  %v2162_v44 = vpop.eup %2161  ;;  %v3603_v60 = vld [vmem:[#allocation24_spill] sm:$0xff]  ;;  %v1327_v0 = vmul.f32 0.5, %v1263_v24  ;;  %v1393_v43 = vmul.f32 %v1329_v42, %v3300_v1 }
 0x19e   : > { %v1395_v58 = vmul.f32 %v1331_v34, %v3603_v60  ;;  %v2164_v28 = vpop.eup %2163  ;;  %v1259_v49 = vadd.f32 1.0, %v2162_v44  ;;  %v1325_v53 = vmul.f32 0.5, %v1261_v5 }
 0x19f   : > { %v1257_v38 = vadd.f32 1.0, %v2164_v28  ;;  %v1391_v32 = vmul.f32 %v1327_v0, %v3308_v51 }
 0x1a0   : > { %1575 = vmatmul.bf16.vlgmr.msrb.gmra.mxu3 %v3407_v3  ;;  %v2166_v36 = vpop.eup %2165  ;;  %v1443_v20 = vpack.c.bf16 %v1397_v21, %v1395_v58  ;;  %v1323_v63 = vmul.f32 0.5, %v1259_v49  ;;  %v1389_v1 = vmul.f32 %v1325_v53, %v3316_v33 }
 0x1a1   : > { %1625 = vmatpush.bf16.msra.mxu3 %v1449_v30  ;;  %v2168_v12 = vpop.eup %2167  ;;  %v1255_v39 = vadd.f32 1.0, %v2166_v36  ;;  %v1441_v11 = vpack.c.bf16 %v1393_v43, %v1391_v32  ;;  %v1321_v18 = vmul.f32 0.5, %v1257_v38 }
 0x1a2   : > { %v2170_v26 = vpop.eup %2169  ;;  %v1253_v9 = vadd.f32 1.0, %v2168_v12  ;;  %v1387_v6 = vmul.f32 %v1323_v63, %v3328_v16  ;;  %v1969_v16 = vld [vmem:[%s3505_s3 + $0x24] sm:$0xf] }
 0x1a3   : > { %v1319_v46 = vmul.f32 0.5, %v1255_v39  ;;  %v1251_v15 = vadd.f32 1.0, %v2170_v26  ;;  %v1385_v51 = vmul.f32 %v1321_v18, %v3324_v35  ;;  %v1923_v35 = vld [vmem:[%s3505_s3 + $0x28] sm:$0xf0] }
 0x1a4   : > { %v1439_v19 = vpack.c.bf16 %v1389_v1, %v1387_v6  ;;  %v1317_v29 = vmul.f32 0.5, %v1253_v9  ;;  %v1926_v30 = vor.u32 %v1969_v16, %v1923_v35  ;;  %v1481_v5 = vpop.permute.xlu0 %1480 }
 0x1a5   : > { %1626 = vmatpush.bf16.msra.mxu3 %v1447_v17  ;;  %v1383_v50 = vmul.f32 %v1319_v46, %v3340_v25  ;;  %v1315_v55 = vmul.f32 0.5, %v1251_v15 }
 0x1a6   : > { %v1381_v33 = vmul.f32 %v1317_v29, %v3312_v10  ;;  %v1971_v10 = vld [vmem:[%s3505_s3 + $0x34] sm:$0xf] }
 0x1a7   : > { %v1437_v62 = vpack.c.bf16 %v1385_v51, %v1383_v50  ;;  %v1379_v2 = vmul.f32 %v1315_v55, %v3334_v31  ;;  %v1931_v31 = vld [vmem:[%s3505_s3 + $0x38] sm:$0xf0] }
 0x1a8   : > { %v1934_v25 = vor.u32 %v1971_v10, %v1931_v31 }
 0x1a9   : > { %1627 = vmatpush.bf16.msra.mxu3 %v1445_v52  ;;  %v1435_v41 = vpack.c.bf16 %v1381_v33, %v1379_v2  ;;  %v1476_v52 = vpop.permute.xlu2 %1475 }
 0x1ac   : > { %1609 = vmatmul.bf16.gmra.mxu2 %v3604_v14  ;;  %v1496_v39 = vpop.permute.xlu0 %1495 }
 0x1ad   : > { %1628 = vmatpush.bf16.msra.mxu3 %v1443_v20 }
 0x1b0   : > { %1580 = vmatmul.bf16.gmra.mxu3 %v1918_v13 }
 0x1b1   : > { %1629 = vmatpush.bf16.msra.mxu3 %v1441_v11  ;;  %v1491_v38 = vpop.permute.xlu2 %1490 }
 0x1b5   : > { %1630 = vmatpush.bf16.msra.mxu3 %v1439_v19 }
 0x1b9   : > { %1631 = vmatpush.bf16.msra.mxu3 %v1437_v62 }
 0x1bc   : > { %1614 = vmatmul.bf16.gmra.mxu2 %v3605_v23 }
 0x1bd   : > { %1632 = vmatpush.bf16.msra.mxu3 %v1435_v41 }
 0x1c0   : > { %1585 = vmatmul.bf16.gmra.mxu3 %v1926_v30 }
 0x1cc   : > { %1619 = vmatmul.bf16.gmra.mxu2 %v3359_v48  ;;  %v1471_v48 = vpop.permute.xlu1 %1470 }
 0x1d0   : > { %1590 = vmatmul.bf16.gmra.mxu3 %v1934_v25 }
 0x1d4   : > { %v1486_v12 = vpop.permute.xlu1 %1485 }
 0x1df   : > { %v1547_v40 = vpop.f32.mrf.mxu2 }
 0x1e0   : > { %1633 = vmatmul.bf16.vlgmr.msra.gmra.mxu3 %v3407_v3  ;;  %v1548_v54 = vadd.f32 %v1547_v40, %v1461_v61 }
 0x1e7   : > { %v1549_v57 = vpop.f32.mrf.mxu2 }
 0x1e8   : > { %v1550_v34 = vadd.f32 %v1549_v57, %v1466_v22 }
 0x1ef   : > { %v1552_v37 = vpop.f32.mrf.mxu2 }
 0x1f0   : > { %1638 = vmatmul.bf16.gmra.mxu3 %v1918_v13  ;;  %v1553_v7 = vadd.f32 %v1552_v37, %v1471_v48 }
 0x1f7   : > { %v1554_v27 = vpop.f32.mrf.mxu2 }
 0x1f8   : > { %v1555_v60 = vadd.f32 %v1554_v27, %v1476_v52 }
 0x1ff   : > { %v1557_v17 = vpop.f32.mrf.mxu2 }
 0x200   : > { %1643 = vmatmul.bf16.gmra.mxu3 %v1926_v30  ;;  %v1558_v28 = vadd.f32 %v1557_v17, %v1481_v5 }
 0x207   : > { %v1559_v24 = vpop.f32.mrf.mxu2 }
 0x208   : > { %v1560_v20 = vadd.f32 %v1559_v24, %v1486_v12 }
 0x20f   : > { %v1562_v42 = vpop.f32.mrf.mxu2 }
 0x210   : > { %1648 = vmatmul.bf16.gmra.mxu3 %v1934_v25  ;;  %v1563_v45 = vadd.f32 %v1562_v42, %v1491_v38 }
 0x217   : > { %v1564_v36 = vpop.f32.mrf.mxu2 }
 0x218   : > { %v1565_v26 = vadd.f32 %v1564_v36, %v1496_v39 }
 0x21f   : > { %v1605_v8 = vpop.f32.mrf.mxu2 }
 0x220   : > { %v1606_v1 = vadd.f32 %v1605_v8, %v1461_v61 }
 0x223   : > { %v1576_v59 = vpop.f32.mrf.mxu3 }
 0x224   : > { %v1577_v47 = vadd.f32 %v1576_v59, %v1548_v54 }
 0x227   : > { %v1607_v9 = vpop.f32.mrf.mxu2 }
 0x228   : > { %v1608_v15 = vadd.f32 %v1607_v9, %v1466_v22 }
 0x22b   : > { %v1578_v56 = vpop.f32.mrf.mxu3 }
 0x22c   : > { %v1579_v4 = vadd.f32 %v1578_v56, %v1550_v34 }
 0x22f   : > { %v1610_v6 = vpop.f32.mrf.mxu2 }
 0x230   : > { %v1611_v55 = vadd.f32 %v1610_v6, %v1471_v48 }
 0x233   : > { %v1581_v3 = vpop.f32.mrf.mxu3 }
 0x234   : > { %v1582_v44 = vadd.f32 %v1581_v3, %v1553_v7 }
 0x237   : > { %v1612_v50 = vpop.f32.mrf.mxu2 }
 0x238   : > { %v1613_v16 = vadd.f32 %v1612_v50, %v1476_v52 }
 0x23b   : > { %v1583_v58 = vpop.f32.mrf.mxu3 }
 0x23c   : > { %v1584_v21 = vadd.f32 %v1583_v58, %v1555_v60 }
 0x23f   : > { %v1615_v41 = vpop.f32.mrf.mxu2 }
 0x240   : > { %v1616_v10 = vadd.f32 %v1615_v41, %v1481_v5 }
 0x243   : > { %v1586_v0 = vpop.f32.mrf.mxu3 }
 0x244   : > { %v1587_v49 = vadd.f32 %v1586_v0, %v1558_v28 }
 0x247   : > { %v1617_v31 = vpop.f32.mrf.mxu2 }
 0x248   : > { %v1618_v37 = vadd.f32 %v1617_v31, %v1486_v12 }
 0x24b   : > { %v1588_v43 = vpop.f32.mrf.mxu3 }
 0x24c   : > { %v1589_v53 = vadd.f32 %v1588_v43, %v1560_v20 }
 0x24f   : > { %v1620_v54 = vpop.f32.mrf.mxu2 }
 0x253   : > { %v1591_v32 = vpop.f32.mrf.mxu3 }
 0x254   : > { %v1592_v63 = vadd.f32 %v1591_v32, %v1563_v45 }
 0x257   : > { %v1622_v56 = vpop.f32.mrf.mxu2 }
 0x25b   : > { %v1593_v11 = vpop.f32.mrf.mxu3 }
 0x25c   : > { %v1594_v13 = vadd.f32 %v1593_v11, %v1565_v26 }
 0x263   : > { %v1634_v18 = vpop.f32.mrf.mxu3 }
 0x264   : > { %v1635_v14 = vadd.f32 %v1634_v18, %v1606_v1 }
 0x266   : > { %v1654_v46 = vpack.c.bf16 %v1635_v14, %v1577_v47  ;;  %v1621_v47 = vadd.f32 %v1620_v54, %v1491_v38 }
 0x268   : > { %1662 = vst [vmem:[%s3453_s8] sm:$0xff] %v1654_v46 }
 0x26b   : > { %v1636_v19 = vpop.f32.mrf.mxu3 }
 0x26c   : > { %v1637_v51 = vadd.f32 %v1636_v19, %v1608_v15 }
 0x26e   : > { %v1655_v29 = vpack.c.bf16 %v1637_v51, %v1579_v4  ;;  %v1623_v4 = vadd.f32 %v1622_v56, %v1496_v39 }
 0x270   : > { %1663 = vst [vmem:[%s3453_s8 + $0x8] sm:$0xff] %v1655_v29 }
 0x273   : > { %v1639_v62 = vpop.f32.mrf.mxu3 }
 0x274   : > { %v1640_v33 = vadd.f32 %v1639_v62, %v1611_v55 }
 0x276   : > { %v1656_v2 = vpack.c.bf16 %v1640_v33, %v1582_v44 }
 0x278   : > { %1664 = vst [vmem:[%s3453_s8 + $0x10] sm:$0xff] %v1656_v2 }
 0x27b   : > { %v1641_v35 = vpop.f32.mrf.mxu3 }
 0x27c   : > { %v1642_v30 = vadd.f32 %v1641_v35, %v1613_v16 }
 0x27e   : > { %v1657_v23 = vpack.c.bf16 %v1642_v30, %v1584_v21 }
 0x280   : > { %1665 = vst [vmem:[%s3453_s8 + $0x18] sm:$0xff] %v1657_v23 }
 0x283   : > { %v1644_v25 = vpop.f32.mrf.mxu3 }
 0x284   : > { %v1645_v40 = vadd.f32 %v1644_v25, %v1616_v10 }
 0x286   : > { %v1658_v57 = vpack.c.bf16 %v1645_v40, %v1587_v49 }
 0x288   : > { %1666 = vst [vmem:[%s3453_s8 + $0x20] sm:$0xff] %v1658_v57 }
 0x28b   : > { %v1646_v27 = vpop.f32.mrf.mxu3 }
 0x28c   : > { %v1647_v61 = vadd.f32 %v1646_v27, %v1618_v37 }
 0x28e   : > { %v1659_v59 = vpack.c.bf16 %v1647_v61, %v1589_v53 }
 0x290   : > { %1667 = vst [vmem:[%s3453_s8 + $0x28] sm:$0xff] %v1659_v59 }
 0x293   : > { %v1649_v22 = vpop.f32.mrf.mxu3 }
 0x294   : > { %v1650_v17 = vadd.f32 %v1649_v22, %v1621_v47 }
 0x296   : > { %v1660_v34 = vpack.c.bf16 %v1650_v17, %v1592_v63 }
 0x298   : > { %1668 = vst [vmem:[%s3453_s8 + $0x30] sm:$0xff] %v1660_v34 }
 0x29b   : > { %v1651_v48 = vpop.f32.mrf.mxu3 }
 0x29c   : > { %v1652_v7 = vadd.f32 %v1651_v48, %v1623_v4 }
 0x29e   : > { %v1661_v24 = vpack.c.bf16 %v1652_v7, %v1594_v13 }
 0x2a0   : > { %1669 = vst [vmem:[%s3453_s8 + $0x38] sm:$0xff] %v1661_v24 }
 0x2a1   : > { %2198 = shalt.err (!%p2195_p5)
}
 0x2a2   : > { %s2252_s29 = smov 128   ;;  %s2253_s8 = smov 8  }
 0x2a3   : > { %1982 = dma.vmem_to_hbm [thread:$0]  (%p2324_p4), %s1686_s13, 1024, %s1688_s14, %s1671_s15, %s2252_s29, %s2252_s29, %s2253_s8  }
 0x2a4 PF: > { %p1988_p6 = scmp.ge.s32.totalorder %s2249_s23, 2  ;;  %s1702_s9 = sand.u32 1, %s2229_s18  }
 0x2a5   : > { %s1703_s10 = scalar_lea.sflag [#allocation3], %s1702_s9 }
 0x2a6   : > { %p1985_p7 = pnand %p1988_p6, %p2331_p8 }
 0x2a8   : > { %p1986_p9 = pneg %p1985_p7 }
 0x2aa   : > { %2224 = dma.done.wait (%p1986_p9), %s1703_s10, 1024  }
 0x2ab   : > { %2226 = vsyncadd (%p1986_p9), %s1703_s10, 4294966272  ;;  %s18_s23 = sadd.s32 1, %s2249_s23   ;;  %s3606_s18 = smov %s2233_s19 }
 0x2ac   : > { %p15_p10 = scmp.ge.s32.totalorder %s18_s23, 4   ;;  %s3607_s19 = smov %s2237_s20 }
 0x2ad   : > { %s3608_s20 = smov %s2337_s6  ;;  %s3609_s21 = smov %s2245_s22 }
 0x2ae   : > { %s3610_s22 = smov %s3612_s26  ;;  %17 = sbr.rel (!%p15_p10) target bundleno = 4 (0x4), region = 75 }
 0x2b3   :  { %1709 = vsyncpa [#allocation3], 1 }
 0x2b4   :  { %1711 = vsyncpa [#allocation3 + $0x1], 1 }

</bundles_post_ra>
